<compile_context>
chip_gen: v6e
topology: v6e:2x2x1
jax: 0.10.0
libtpu: 0.0.40
codegen_flags: <defaults>
</compile_context>

<pallas_src>
import jax
import jax.numpy as jnp
from jax import lax
from jax.experimental import pallas as pl
from jax.experimental.pallas import tpu as pltpu


def _self_attention_kernel(x_q_ref, x_kv_ref, wq_ref, bq_ref, wkv_ref,
                           bkv_ref, gamma_ref, o_ref,
                           q_sc, m_sc, l_sc, acc_sc):
    # x_q_ref : (1, tq, Cp)   x_kv_ref : (1, tk, Cp)
    # wq_ref  : (Cp, Cqp)     bq_ref   : (1, Cqp)
    # wkv_ref : (Cp, Cqp+Cp)  bkv_ref  : (1, Cqp+Cp)   gamma_ref : (1, 1)
    # q_sc: (tq, Cqp) bf16, m_sc/l_sc: (tq, 1) f32, acc_sc: (tq, Cp) f32
    ki = pl.program_id(2)
    cqp = q_sc.shape[-1]

    @pl.when(ki == 0)
    def _():
        # init online-softmax state and cache the projected query tile
        m_sc[...] = jnp.full_like(m_sc, -jnp.inf)
        l_sc[...] = jnp.zeros_like(l_sc)
        acc_sc[...] = jnp.zeros_like(acc_sc)
        xq = x_q_ref[0]
        q = jnp.dot(xq, wq_ref[...],
                    preferred_element_type=jnp.float32) + bq_ref[...]
        q_sc[...] = q.astype(q_sc.dtype)

    # fused k|v projection for this kv tile (one wide, lane-dense matmul)
    xkv = x_kv_ref[0]
    kv = jnp.dot(xkv, wkv_ref[...],
                 preferred_element_type=jnp.float32) + bkv_ref[...]
    k = kv[:, :cqp].astype(jnp.bfloat16)       # (tk, Cqp)
    v = kv[:, cqp:].astype(jnp.bfloat16)       # (tk, Cp)

    # energy[i, j] = <q_i, k_j>  -- contract last dims, no k transpose
    s = lax.dot_general(q_sc[...], k,
                        dimension_numbers=(((1,), (1,)), ((), ())),
                        preferred_element_type=jnp.float32)   # (tq, tk)

    m_prev = m_sc[...]
    m_new = jnp.maximum(m_prev, jnp.max(s, axis=-1, keepdims=True))
    alpha = jnp.exp(m_prev - m_new)
    p = jnp.exp(s - m_new)                                      # f32 softmax math
    l_sc[...] = alpha * l_sc[...] + jnp.sum(p, axis=-1, keepdims=True)
    acc_sc[...] = alpha * acc_sc[...] + jnp.dot(
        p.astype(jnp.bfloat16), v, preferred_element_type=jnp.float32)
    m_sc[...] = m_new

    @pl.when(ki == pl.num_programs(2) - 1)
    def _():
        # single normalize at the end (error applied once per row)
        inv_l = pl.reciprocal(l_sc[...], approx=True)
        out = acc_sc[...] * inv_l
        o_ref[0] = (gamma_ref[0, 0] * out + x_q_ref[0]).astype(o_ref.dtype)


def _round_up(v, m):
    return ((v + m - 1) // m) * m


def _fit_tile(n, requested):
    """Largest multiple of 8 that divides n and is <= requested (else n)."""
    best = None
    t = 8
    cap = min(requested, n)
    while t <= cap:
        if n % t == 0:
            best = t
        t += 8
    return best if best is not None else n


def self_attention_pallas(x_nchw, params, *, tq=256, tk=512):
    B, C, W, H = x_nchw.shape
    N = W * H
    Cq = C // 8

    # lane-dense padding targets
    Cp = _round_up(C, 128)
    Cqp = _round_up(Cq, 128)

    tq = _fit_tile(N, tq)
    tk = _fit_tile(N, tk)
    num_q = N // tq
    num_kv = N // tk

    # glue: NCHW -> (B, N, C) -> zero-pad channels to Cp
    x = jnp.transpose(x_nchw.reshape(B, C, N), (0, 2, 1))
    x_p = jnp.zeros((B, N, Cp), x.dtype).at[:, :, :C].set(x)

    f32 = jnp.float32
    wq_t = jnp.zeros((Cp, Cqp), f32).at[:C, :Cq].set(params["wq"].T)
    bq_p = jnp.zeros((1, Cqp), f32).at[:, :Cq].set(params["bq"][None, :])
    wkv_t = jnp.zeros((Cp, Cqp + Cp), f32)
    wkv_t = wkv_t.at[:C, :Cq].set(params["wk"].T)
    wkv_t = wkv_t.at[:C, Cqp:Cqp + C].set(params["wv"].T)
    bkv_p = jnp.zeros((1, Cqp + Cp), f32)
    bkv_p = bkv_p.at[:, :Cq].set(params["bk"][None, :])
    bkv_p = bkv_p.at[:, Cqp:Cqp + C].set(params["bv"][None, :])
    gamma = params["gamma"].reshape(1, 1).astype(f32)

    shared = lambda shape: pl.BlockSpec(shape, lambda b, qi, ki: (0,) * len(shape))

    flops = int(
        2 * B * N * Cp * Cqp                      # q projection
        + 2 * B * num_q * N * Cp * (Cqp + Cp)     # fused k|v projection
        + 2 * B * N * N * Cqp                     # q @ k^T
        + 2 * B * N * N * Cp                      # attn @ v
    )
    transcendentals = int(B * N * N + B * N * num_kv)
    bytes_accessed = int(4 * (B * N * Cp * (1 + num_q)      # x reads
                              + B * N * Cp                   # output
                              + Cp * (2 * Cqp + Cp)))        # weights

    out_p = pl.pallas_call(
        _self_attention_kernel,
        out_shape=jax.ShapeDtypeStruct((B, N, Cp), x.dtype),
        grid=(B, num_q, num_kv),
        in_specs=[
            pl.BlockSpec((1, tq, Cp), lambda b, qi, ki: (b, qi, 0)),   # x (query tile)
            pl.BlockSpec((1, tk, Cp), lambda b, qi, ki: (b, ki, 0)),   # x (kv tile)
            shared((Cp, Cqp)),                                         # Wq^T
            shared((1, Cqp)),                                          # bq
            shared((Cp, Cqp + Cp)),                                    # [Wk^T | Wv^T]
            shared((1, Cqp + Cp)),                                     # [bk | bv]
            shared((1, 1)),                                            # gamma
        ],
        out_specs=pl.BlockSpec((1, tq, Cp), lambda b, qi, ki: (b, qi, 0)),
        scratch_shapes=[
            pltpu.VMEM((tq, Cqp), jnp.bfloat16),   # cached projected q tile
            pltpu.VMEM((tq, 1), jnp.float32),      # running max
            pltpu.VMEM((tq, 1), jnp.float32),      # running sum
            pltpu.VMEM((tq, Cp), jnp.float32),     # output accumulator
        ],
        compiler_params=pltpu.CompilerParams(
            dimension_semantics=("parallel", "parallel", "arbitrary")),
        cost_estimate=pl.CostEstimate(
            flops=flops, transcendentals=transcendentals,
            bytes_accessed=bytes_accessed),
    )(x_p, x_p, wq_t, bq_p, wkv_t, bkv_p, gamma)

    # glue: drop channel padding, (B, N, C) -> NCHW
    out = out_p[:, :, :C]
    return jnp.transpose(out, (0, 2, 1)).reshape(B, C, W, H)


def self_attention_ref(x_nchw, params):
    """Plain-JAX reference that mirrors the PyTorch forward exactly."""
    B, C, W, H = x_nchw.shape
    N = W * H
    x = x_nchw.reshape(B, C, N)                                      # (B, C, N)

    def conv1x1(w, b):  # w: (O, C), b: (O,)
        return jnp.einsum("oc,bcn->bon", w, x) + b[None, :, None]

    q = conv1x1(params["wq"], params["bq"])                          # (B, Cq, N)
    k = conv1x1(params["wk"], params["bk"])                          # (B, Cq, N)
    v = conv1x1(params["wv"], params["bv"])                          # (B, C, N)

    energy = jnp.einsum("bci,bcj->bij", q, k)                        # (B, N, N)
    attn = jax.nn.softmax(energy, axis=-1)
    out = jnp.einsum("bcj,bij->bci", v, attn)                        # (B, C, N)
    out = out.reshape(B, C, W, H)
    return params["gamma"][0] * out + x_nchw


if __name__ == "__main__":
    B, C, W, H = 2, 16, 16, 16      # in_dim=16 -> query/key dim = 2, N = 256
    Cq = C // 8

    key = jax.random.PRNGKey(0)
    kx, kq, kk, kv, kbq, kbk, kbv = jax.random.split(key, 7)

    x = jax.random.normal(kx, (B, C, W, H), dtype=jnp.float32)

    params = {
        "wq": 0.1 * jax.random.normal(kq, (Cq, C), dtype=jnp.float32),
        "bq": 0.1 * jax.random.normal(kbq, (Cq,), dtype=jnp.float32),
        "wk": 0.1 * jax.random.normal(kk, (Cq, C), dtype=jnp.float32),
        "bk": 0.1 * jax.random.normal(kbk, (Cq,), dtype=jnp.float32),
        "wv": 0.1 * jax.random.normal(kv, (C, C), dtype=jnp.float32),
        "bv": 0.1 * jax.random.normal(kbv, (C,), dtype=jnp.float32),
        # nn.Parameter(torch.zeros(1)) in the module; set nonzero here so the
        # attention path is actually exercised by the check.
        "gamma": jnp.array([0.5], dtype=jnp.float32),
    }

    # tq=tk=128 -> grid (2, 2, 2): exercises multi-tile online softmax.
    out = self_attention_pallas(x, params, tq=128, tk=128)
    out = jax.block_until_ready(out)

    ref = self_attention_ref(x, params)
    assert out.shape == (B, C, W, H)
    # bf16 matmul operands + approx reciprocal -> loosened tolerance.
    err = jnp.max(jnp.abs(out - ref))
    assert jnp.allclose(out, ref, rtol=2e-2, atol=2e-2), f"max abs err {err}"

    print("KERNEL_OK")
</pallas_src>

<mosaic_0001>
module attributes {stable_mosaic.version = 11 : i64} {
  func.func @_self_attention_kernel(%arg0: i32, %arg1: i32, %arg2: i32, %arg3: memref<1x128x128xf32, #tpu.memory_space<vmem>>, %arg4: memref<1x128x128xf32, #tpu.memory_space<vmem>>, %arg5: memref<128x128xf32, #tpu.memory_space<vmem>>, %arg6: memref<1x128xf32, #tpu.memory_space<vmem>>, %arg7: memref<128x256xf32, #tpu.memory_space<vmem>>, %arg8: memref<1x256xf32, #tpu.memory_space<vmem>>, %arg9: memref<1x1xf32, #tpu.memory_space<vmem>>, %arg10: memref<1x128x128xf32, #tpu.memory_space<vmem>>, %arg11: memref<128x128xbf16, #tpu.memory_space<vmem>>, %arg12: memref<128x1xf32, #tpu.memory_space<vmem>>, %arg13: memref<128x1xf32, #tpu.memory_space<vmem>>, %arg14: memref<128x128xf32, #tpu.memory_space<vmem>>) attributes {dimension_semantics = [#tpu.dimension_semantics<parallel>, #tpu.dimension_semantics<parallel>, #tpu.dimension_semantics<arbitrary>], iteration_bounds = array<i64: 2, 2, 2>, scalar_prefetch = 0 : i64, scratch_operands = 4 : i64, tpu.core_type = #tpu.core_type<tc>, window_params = [{transform_indices = @transform_0, window_bounds = array<i64: 1, 128, 128>}, {transform_indices = @transform_1, window_bounds = array<i64: 1, 128, 128>}, {pipeline_mode = #tpu.pipeline_mode<synchronous>, transform_indices = @transform_2, window_bounds = array<i64: 128, 128>}, {pipeline_mode = #tpu.pipeline_mode<synchronous>, transform_indices = @transform_3, window_bounds = array<i64: 1, 128>}, {pipeline_mode = #tpu.pipeline_mode<synchronous>, transform_indices = @transform_4, window_bounds = array<i64: 128, 256>}, {pipeline_mode = #tpu.pipeline_mode<synchronous>, transform_indices = @transform_5, window_bounds = array<i64: 1, 256>}, {pipeline_mode = #tpu.pipeline_mode<synchronous>, transform_indices = @transform_6, window_bounds = array<i64: 1, 1>}, {transform_indices = @transform_7, window_bounds = array<i64: 1, 128, 128>}]} {
    %c0_i32 = arith.constant 0 : i32
    %0 = arith.cmpi eq, %arg2, %c0_i32 : i32
    %1 = arith.extui %0 : i1 to i32
    %c0_i32_0 = arith.constant 0 : i32
    %2 = arith.cmpi ne, %1, %c0_i32_0 : i32
    scf.if %2 {
      %cst_26 = arith.constant 0xFF800000 : f32
      %42 = vector.broadcast %cst_26 : f32 to vector<128x1xf32>
      %c0_27 = arith.constant 0 : index
      %c0_28 = arith.constant 0 : index
      %43 = vector.load %arg12[%c0_27, %c0_28] : memref<128x1xf32, #tpu.memory_space<vmem>>, vector<128x1xf32>
      tpu.vector_store %arg12[%c0_27, %c0_28], %42 {strides = array<i32>} : memref<128x1xf32, #tpu.memory_space<vmem>>, vector<128x1xf32>,
      %cst_29 = arith.constant 0.000000e+00 : f32
      %44 = vector.broadcast %cst_29 : f32 to vector<128x1xf32>
      %c0_30 = arith.constant 0 : index
      %c0_31 = arith.constant 0 : index
      %45 = vector.load %arg13[%c0_30, %c0_31] : memref<128x1xf32, #tpu.memory_space<vmem>>, vector<128x1xf32>
      tpu.vector_store %arg13[%c0_30, %c0_31], %44 {strides = array<i32>} : memref<128x1xf32, #tpu.memory_space<vmem>>, vector<128x1xf32>,
      %cst_32 = arith.constant 0.000000e+00 : f32
      %46 = vector.broadcast %cst_32 : f32 to vector<128x128xf32>
      %c0_33 = arith.constant 0 : index
      %c0_34 = arith.constant 0 : index
      %47 = vector.load %arg14[%c0_33, %c0_34] : memref<128x128xf32, #tpu.memory_space<vmem>>, vector<128x128xf32>
      tpu.vector_store %arg14[%c0_33, %c0_34], %46 {strides = array<i32>} : memref<128x128xf32, #tpu.memory_space<vmem>>, vector<128x128xf32>,
      %c0_35 = arith.constant 0 : index
      %c0_36 = arith.constant 0 : index
      %c0_37 = arith.constant 0 : index
      %48 = vector.load %arg3[%c0_35, %c0_36, %c0_37] : memref<1x128x128xf32, #tpu.memory_space<vmem>>, vector<1x128x128xf32>
      %49 = vector.shape_cast %48 : vector<1x128x128xf32> to vector<128x128xf32>
      %c0_38 = arith.constant 0 : index
      %c0_39 = arith.constant 0 : index
      %50 = vector.load %arg5[%c0_38, %c0_39] : memref<128x128xf32, #tpu.memory_space<vmem>>, vector<128x128xf32>
      %cst_40 = arith.constant dense<0.000000e+00> : vector<128x128xf32>
      %51 = tpu.matmul %49, %50, %cst_40 {dimension_numbers = #tpu.dot_dimension_numbers<[1], [0], [0], [1], [0, 0, 1, 1], [], []>} : vector<128x128xf32>, vector<128x128xf32>, vector<128x128xf32> -> vector<128x128xf32>
      %c0_41 = arith.constant 0 : index
      %c0_42 = arith.constant 0 : index
      %52 = vector.load %arg6[%c0_41, %c0_42] : memref<1x128xf32, #tpu.memory_space<vmem>>, vector<1x128xf32>
      %53 = vector.broadcast %52 : vector<1x128xf32> to vector<128x128xf32>
      %54 = arith.addf %51, %53 : vector<128x128xf32>
      %55 = arith.truncf %54 : vector<128x128xf32> to vector<128x128xbf16>
      %c0_43 = arith.constant 0 : index
      %c0_44 = arith.constant 0 : index
      %56 = vector.load %arg11[%c0_43, %c0_44] : memref<128x128xbf16, #tpu.memory_space<vmem>>, vector<128x128xbf16>
      tpu.vector_store %arg11[%c0_43, %c0_44], %55 {strides = array<i32>} : memref<128x128xbf16, #tpu.memory_space<vmem>>, vector<128x128xbf16>,
    } else {
    }
    %c0 = arith.constant 0 : index
    %c0_1 = arith.constant 0 : index
    %c0_2 = arith.constant 0 : index
    %3 = vector.load %arg4[%c0, %c0_1, %c0_2] : memref<1x128x128xf32, #tpu.memory_space<vmem>>, vector<1x128x128xf32>
    %4 = vector.shape_cast %3 : vector<1x128x128xf32> to vector<128x128xf32>
    %c0_3 = arith.constant 0 : index
    %c0_4 = arith.constant 0 : index
    %5 = vector.load %arg7[%c0_3, %c0_4] : memref<128x256xf32, #tpu.memory_space<vmem>>, vector<128x256xf32>
    %cst = arith.constant dense<0.000000e+00> : vector<128x256xf32>
    %6 = tpu.matmul %4, %5, %cst {dimension_numbers = #tpu.dot_dimension_numbers<[1], [0], [0], [1], [0, 0, 1, 1], [], []>} : vector<128x128xf32>, vector<128x256xf32>, vector<128x256xf32> -> vector<128x256xf32>
    %c0_5 = arith.constant 0 : index
    %c0_6 = arith.constant 0 : index
    %7 = vector.load %arg8[%c0_5, %c0_6] : memref<1x256xf32, #tpu.memory_space<vmem>>, vector<1x256xf32>
    %8 = vector.broadcast %7 : vector<1x256xf32> to vector<128x256xf32>
    %9 = arith.addf %6, %8 : vector<128x256xf32>
    %10 = vector.extract_strided_slice %9 {offsets = [0, 0], sizes = [128, 128], strides = [1, 1]} : vector<128x256xf32> to vector<128x128xf32>
    %11 = arith.truncf %10 : vector<128x128xf32> to vector<128x128xbf16>
    %12 = vector.extract_strided_slice %9 {offsets = [0, 128], sizes = [128, 128], strides = [1, 1]} : vector<128x256xf32> to vector<128x128xf32>
    %13 = arith.truncf %12 : vector<128x128xf32> to vector<128x128xbf16>
    %c0_7 = arith.constant 0 : index
    %c0_8 = arith.constant 0 : index
    %14 = vector.load %arg11[%c0_7, %c0_8] : memref<128x128xbf16, #tpu.memory_space<vmem>>, vector<128x128xbf16>
    %cst_9 = arith.constant dense<0.000000e+00> : vector<128x128xf32>
    %15 = tpu.matmul %14, %11, %cst_9 {dimension_numbers = #tpu.dot_dimension_numbers<[1], [1], [0], [0], [0, 0, 1, 0], [], []>} : vector<128x128xbf16>, vector<128x128xbf16>, vector<128x128xf32> -> vector<128x128xf32>
    %c0_10 = arith.constant 0 : index
    %c0_11 = arith.constant 0 : index
    %16 = vector.load %arg12[%c0_10, %c0_11] : memref<128x1xf32, #tpu.memory_space<vmem>>, vector<128x1xf32>
    %cst_12 = arith.constant dense<0xFF800000> : vector<128xf32>
    %17 = vector.multi_reduction <maximumf>, %15, %cst_12 [1] : vector<128x128xf32> to vector<128xf32>
    %18 = vector.shape_cast %17 : vector<128xf32> to vector<128x1xf32>
    %19 = arith.maximumf %16, %18 : vector<128x1xf32>
    %20 = arith.subf %16, %19 : vector<128x1xf32>
    %21 = math.exp %20 : vector<128x1xf32>
    %22 = vector.broadcast %19 : vector<128x1xf32> to vector<128x128xf32>
    %23 = arith.subf %15, %22 : vector<128x128xf32>
    %24 = math.exp %23 : vector<128x128xf32>
    %c0_13 = arith.constant 0 : index
    %c0_14 = arith.constant 0 : index
    %25 = vector.load %arg13[%c0_13, %c0_14] : memref<128x1xf32, #tpu.memory_space<vmem>>, vector<128x1xf32>
    %26 = arith.mulf %21, %25 : vector<128x1xf32>
    %cst_15 = arith.constant dense<0.000000e+00> : vector<128xf32>
    %27 = vector.multi_reduction <add>, %24, %cst_15 [1] : vector<128x128xf32> to vector<128xf32>
    %28 = vector.shape_cast %27 : vector<128xf32> to vector<128x1xf32>
    %29 = arith.addf %26, %28 : vector<128x1xf32>
    %c0_16 = arith.constant 0 : index
    %c0_17 = arith.constant 0 : index
    %30 = vector.load %arg13[%c0_16, %c0_17] : memref<128x1xf32, #tpu.memory_space<vmem>>, vector<128x1xf32>
    tpu.vector_store %arg13[%c0_16, %c0_17], %29 {strides = array<i32>} : memref<128x1xf32, #tpu.memory_space<vmem>>, vector<128x1xf32>,
    %c0_18 = arith.constant 0 : index
    %c0_19 = arith.constant 0 : index
    %31 = vector.load %arg14[%c0_18, %c0_19] : memref<128x128xf32, #tpu.memory_space<vmem>>, vector<128x128xf32>
    %32 = vector.broadcast %21 : vector<128x1xf32> to vector<128x128xf32>
    %33 = arith.mulf %32, %31 : vector<128x128xf32>
    %34 = arith.truncf %24 : vector<128x128xf32> to vector<128x128xbf16>
    %cst_20 = arith.constant dense<0.000000e+00> : vector<128x128xf32>
    %35 = tpu.matmul %34, %13, %cst_20 {dimension_numbers = #tpu.dot_dimension_numbers<[1], [0], [0], [1], [0, 0, 1, 1], [], []>} : vector<128x128xbf16>, vector<128x128xbf16>, vector<128x128xf32> -> vector<128x128xf32>
    %36 = arith.addf %33, %35 : vector<128x128xf32>
    %c0_21 = arith.constant 0 : index
    %c0_22 = arith.constant 0 : index
    %37 = vector.load %arg14[%c0_21, %c0_22] : memref<128x128xf32, #tpu.memory_space<vmem>>, vector<128x128xf32>
    tpu.vector_store %arg14[%c0_21, %c0_22], %36 {strides = array<i32>} : memref<128x128xf32, #tpu.memory_space<vmem>>, vector<128x128xf32>,
    %c0_23 = arith.constant 0 : index
    %c0_24 = arith.constant 0 : index
    %38 = vector.load %arg12[%c0_23, %c0_24] : memref<128x1xf32, #tpu.memory_space<vmem>>, vector<128x1xf32>
    tpu.vector_store %arg12[%c0_23, %c0_24], %19 {strides = array<i32>} : memref<128x1xf32, #tpu.memory_space<vmem>>, vector<128x1xf32>,
    %c1_i32 = arith.constant 1 : i32
    %39 = arith.cmpi eq, %arg2, %c1_i32 : i32
    %40 = arith.extui %39 : i1 to i32
    %c0_i32_25 = arith.constant 0 : i32
    %41 = arith.cmpi ne, %40, %c0_i32_25 : i32
    scf.if %41 {
      %c0_26 = arith.constant 0 : index
      %c0_27 = arith.constant 0 : index
      %42 = vector.load %arg13[%c0_26, %c0_27] : memref<128x1xf32, #tpu.memory_space<vmem>>, vector<128x1xf32>
      %43 = tpu.reciprocal %42 {approx = true} : vector<128x1xf32> -> vector<128x1xf32>
      %c0_28 = arith.constant 0 : index
      %c0_29 = arith.constant 0 : index
      %44 = vector.load %arg14[%c0_28, %c0_29] : memref<128x128xf32, #tpu.memory_space<vmem>>, vector<128x128xf32>
      %45 = vector.broadcast %43 : vector<128x1xf32> to vector<128x128xf32>
      %46 = arith.mulf %44, %45 : vector<128x128xf32>
      %c0_30 = arith.constant 0 : index
      %c0_31 = arith.constant 0 : index
      %47 = vector.load %arg9[%c0_30, %c0_31] : memref<1x1xf32, #tpu.memory_space<vmem>>, vector<1x1xf32>
      %48 = vector.extract %47[0, 0] : f32 from vector<1x1xf32>
      %49 = vector.broadcast %48 : f32 to vector<128x128xf32>
      %50 = arith.mulf %49, %46 : vector<128x128xf32>
      %c0_32 = arith.constant 0 : index
      %c0_33 = arith.constant 0 : index
      %c0_34 = arith.constant 0 : index
      %51 = vector.load %arg3[%c0_32, %c0_33, %c0_34] : memref<1x128x128xf32, #tpu.memory_space<vmem>>, vector<1x128x128xf32>
      %52 = vector.shape_cast %51 : vector<1x128x128xf32> to vector<128x128xf32>
      %53 = arith.addf %50, %52 : vector<128x128xf32>
      %c0_35 = arith.constant 0 : index
      %c0_36 = arith.constant 0 : index
      %c0_37 = arith.constant 0 : index
      %54 = vector.load %arg10[%c0_35, %c0_36, %c0_37] : memref<1x128x128xf32, #tpu.memory_space<vmem>>, vector<1x128x128xf32>
      %55 = vector.shape_cast %54 : vector<1x128x128xf32> to vector<128x128xf32>
      %56 = vector.shape_cast %53 : vector<128x128xf32> to vector<1x128x128xf32>
      tpu.vector_store %arg10[%c0_35, %c0_36, %c0_37], %56 {strides = array<i32>} : memref<1x128x128xf32, #tpu.memory_space<vmem>>, vector<1x128x128xf32>,
    } else {
    }
    return
  }
  func.func @transform_0(%arg0: i32, %arg1: i32, %arg2: i32) -> (i32, i32, i32) {
    %c0_i32 = arith.constant 0 : i32
    %c0_i32_0 = arith.constant 0 : i32
    return %arg0, %arg1, %c0_i32 : i32, i32, i32
  }
  func.func @transform_1(%arg0: i32, %arg1: i32, %arg2: i32) -> (i32, i32, i32) {
    %c0_i32 = arith.constant 0 : i32
    %c0_i32_0 = arith.constant 0 : i32
    return %arg0, %arg2, %c0_i32 : i32, i32, i32
  }
  func.func @transform_2(%arg0: i32, %arg1: i32, %arg2: i32) -> (i32, i32) {
    %c0_i32 = arith.constant 0 : i32
    %c0_i32_0 = arith.constant 0 : i32
    %c0_i32_1 = arith.constant 0 : i32
    return %c0_i32, %c0_i32_0 : i32, i32
  }
  func.func @transform_3(%arg0: i32, %arg1: i32, %arg2: i32) -> (i32, i32) {
    %c0_i32 = arith.constant 0 : i32
    %c0_i32_0 = arith.constant 0 : i32
    %c0_i32_1 = arith.constant 0 : i32
    return %c0_i32, %c0_i32_0 : i32, i32
  }
  func.func @transform_4(%arg0: i32, %arg1: i32, %arg2: i32) -> (i32, i32) {
    %c0_i32 = arith.constant 0 : i32
    %c0_i32_0 = arith.constant 0 : i32
    %c0_i32_1 = arith.constant 0 : i32
    return %c0_i32, %c0_i32_0 : i32, i32
  }
  func.func @transform_5(%arg0: i32, %arg1: i32, %arg2: i32) -> (i32, i32) {
    %c0_i32 = arith.constant 0 : i32
    %c0_i32_0 = arith.constant 0 : i32
    %c0_i32_1 = arith.constant 0 : i32
    return %c0_i32, %c0_i32_0 : i32, i32
  }
  func.func @transform_6(%arg0: i32, %arg1: i32, %arg2: i32) -> (i32, i32) {
    %c0_i32 = arith.constant 0 : i32
    %c0_i32_0 = arith.constant 0 : i32
    %c0_i32_1 = arith.constant 0 : i32
    return %c0_i32, %c0_i32_0 : i32, i32
  }
  func.func @transform_7(%arg0: i32, %arg1: i32, %arg2: i32) -> (i32, i32, i32) {
    %c0_i32 = arith.constant 0 : i32
    %c0_i32_0 = arith.constant 0 : i32
    return %arg0, %arg1, %c0_i32 : i32, i32, i32
  }
}

</mosaic_0001>

<bundles_post_ra>
// kernel: tpu_custom_call.1
= control target key start
LH: loop header
LB: loop body
LE: loop exit
PB: predicated region body
PF: predicated region fallthrough
CT: control target
= control target key end

     0   :  { %s3861_s0 = inlined_call_operand.hbm [shape: f32[2,256,128], index: 0, kind: input, shape index: {}]   ;;  %s3862_s1 = inlined_call_operand.hbm [shape: f32[2,256,128], index: 1, kind: input, shape index: {}]   ;;  %s3863_s2 = inlined_call_operand.hbm [shape: f32[128,128], index: 2, kind: input, shape index: {}]   ;;  %s3864_s3 = inlined_call_operand.vmem [shape: f32[1,128], index: 3, kind: input, shape index: {}]   ;;  %s3865_s4 = inlined_call_operand.hbm [shape: f32[128,256], index: 4, kind: input, shape index: {}]   ;;  %s3866_s5 = inlined_call_operand.vmem [shape: f32[1,256], index: 5, kind: input, shape index: {}]   ;;  %s3867_s6 = inlined_call_operand.<no memory space> [shape: f32[1,1], index: 6, kind: input, shape index: {}]   ;;  %s3868_s7 = inlined_call_operand.hbm [shape: f32[2,256,128], index: 7, kind: output, shape index: {}]  }
   0x1   :  { %3889 = sst [smem:[#allocation33_spill]] %s3863_s2  ;;  %v12_v0 = vstv %s3867_s6 }
   0x2   :  { %3890 = sst [smem:[#allocation34_spill]] %s3864_s3  ;;  %13 = vst [vmem:[#allocation6] sm:$0x1] %v12_v0 }
   0x3   :  { %3891 = sst [smem:[#allocation35_spill]] %s3865_s4 }
   0x4   :  { %3892 = sst [smem:[#allocation36_spill]] %s3866_s5 }
   0x5   :  { %3893 = sst [smem:[#allocation37_spill]] %s3868_s7 }
   0x6   :  { %14 = vsyncpa [#allocation8], 0 }
   0x7   :  { %16 = vsyncpa [#allocation8 + $0x1], 0 }
   0x8   :  { %17 = vsyncpa [#allocation11], 0 }
   0x9   :  { %19 = vsyncpa [#allocation11 + $0x1], 0 }
   0xa   :  { %20 = vsyncpa [#allocation14], 0 }
   0xb   :  { %21 = vsyncpa [#allocation9], 0 }
   0xc   :  { %23 = vsyncpa [#allocation9 + $0x1], 0  ;;  %s3020_s26 = smov 0   ;;  %s3022_s27 = smov 0  }
   0xd   :  { %s3024_s28 = smov 0   ;;  %s3026_s29 = smov 0  }
   0xe   :  { %s3028_s30 = smov 0   ;;  %s3030_s8 = smov 0  }
   0xf   :  { %s3032_s6 = smov 0   ;;  %s3034_s9 = smov 0  }
  0x10   :  { %s3036_s10 = smov 0   ;;  %s3038_s11 = smov 0  }
  0x11   :  { %s3040_s12 = smov 0   ;;  %s3042_s13 = smov 0  }
  0x12   :  { %s3044_s14 = smov 0  }
  0x13 LB: > { %3894 = sst [smem:[#allocation21_spill]] %s2923_s29  ;;  %s3084_s15 = sadd.s32 4294967295, %s2959_s14   ;;  %s2959_s14 = sphi %s3044_s14, %s29_s14   ;;  %s2955_s13 = sphi %s3042_s13, %s3954_s13   ;;  %s2951_s12 = sphi %s3040_s12, %s3943_s12   ;;  %s2947_s11 = sphi %s3038_s11, %s3953_s11   ;;  %s2943_s10 = sphi %s3036_s10, %s3952_s10   ;;  %s2939_s9 = sphi %s3034_s9, %s3941_s9   ;;  %s2935_s6 = sphi %s3032_s6, %s3951_s6   ;;  %s2931_s8 = sphi %s3030_s8, %s3950_s8   ;;  %s2927_s30 = sphi %s3028_s30, %s3949_s30   ;;  %s2923_s29 = sphi %s3026_s29, %s3948_s29   ;;  %s2919_s28 = sphi %s3024_s28, %s3947_s28   ;;  %s2915_s27 = sphi %s3022_s27, %s3946_s27   ;;  %s2911_s26 = sphi %s3020_s26, %s3945_s26  }
  0x14   : > { %3895 = sst [smem:[#allocation22_spill]] %s2935_s6  ;;  %s2091_s16 = sadd.s32 4294967294, %s2959_s14  }
  0x15   : > { %3896 = sst [smem:[#allocation23_spill]] %s2939_s9  ;;  %p70_p0 = scmp.ne.s32.totalorder %s2927_s30, %s2923_s29 }
  0x16   : > { %3897 = sst [smem:[#allocation24_spill]] %s2943_s10  ;;  %p3886_p1 = scmp.eq.s32.totalorder %s3084_s15, 0 }
  0x17   : > { %3898 = sst [smem:[#allocation25_spill]] %s2951_s12  ;;  %p98_p2 = scmp.ne.s32.totalorder %s2915_s27, %s2911_s26 }
  0x18   : > { %3899 = sst [smem:[#allocation26_spill]] %s3084_s15  ;;  %p3093_p3 = por %p3886_p1, %p70_p0 }
  0x19   : > { %p235_p4 = scmp.eq.s32.totalorder %s2091_s16, 7  ;;  %p3099_p5 = por %p98_p2, %p3886_p1 }
  0x1a   : > { %p2092_p6 = scmp.ge.s32.totalorder %s2959_s14, 1  ;;  %p242_p8 = scmp.lt.s32.totalorder %s2959_s14, 9 }
  0x1b   : > { %s3901_s18 = scalar_select %p3099_p5, 1, 0 }
  0x1c   : > { %p3104_p7 = por %p235_p4, %p70_p0  ;;  %p3109_p9 = pnand %p2092_p6, %p242_p8 }
  0x1d   : > { %3902 = sst [smem:[#allocation27_spill]] %s3901_s18  ;;  %s2961_s21 = smov [#allocation12]  }
  0x1e   : > { %s3903_s19 = scalar_select %p3104_p7, 1, 0 }
  0x1f   : > { %s254_s22 = sshll.u32 %s2961_s21, 4  ;;  %p2454_p10 = pneg %p3109_p9  ;;  %s255_s22 = int_to_ptr.vmem [resolvable:$true] %s254_s22 }
  0x20   : > { %3904 = sst [smem:[#allocation28_spill]] %s3903_s19  ;;  %s2962_s24 = smov [#allocation13]  }
  0x21   : > { %p3117_p11 = pnand %p2454_p10, %p3886_p1  ;;  %s270_s25 = sshll.u32 %s2962_s24, 4  ;;  %s271_s25 = int_to_ptr.vmem [resolvable:$true] %s270_s25 }
  0x22   : > { %s2714_s26 = scalar_lea.vmem %s255_s22, 2048  ;;  %p2722_p4 = scmp.lt.s32.totalorder %s255_s22, %s255_s22 }
  0x23   : > { %p2705_p12 = pneg %p3117_p11  ;;  %p2715_p13 = scmp.ne.s32.totalorder %s255_s22, %s2714_s26 }
  0x24   : > { %p2723_p6 = scmp.lt.s32.totalorder %s2714_s26, %s2714_s26 }
  0x25   : > { %p2717_p0 = pnand %p2715_p13, %p2705_p12 }
  0x26   : > { %p2724_p8 = por %p2723_p6, %p2722_p4 }
  0x27   : > { %p2718_p2 = pneg %p2717_p0 }
  0x29   : > { %p2725_p10 = pnand %p2724_p8, %p2718_p2 }
  0x2b   : > { %2728 = shalt.err (!%p2725_p10)
}
  0x2c   : > { %s3871_s16 = smov 128   ;;  %s3873_s21 = smov 8  }
  0x2d   : > { %s3907_s2 = sld [smem:[#allocation33_spill]]  ;;  %s2740_s29 = scalar_lea.vmem %s271_s25, 4096 }
  0x2e   : > { %p2741_p13 = scmp.ne.s32.totalorder %s271_s25, %s2740_s29  ;;  %p2748_p2 = scmp.lt.s32.totalorder %s271_s25, %s271_s25 }
  0x2f   : > { %p2749_p6 = scmp.lt.s32.totalorder %s2740_s29, %s2740_s29 }
  0x30   : > { %p2743_p0 = pnand %p2741_p13, %p2705_p12 }
  0x31   : > { %p2750_p8 = por %p2749_p6, %p2748_p2 }
  0x32   : > { %p2744_p4 = pneg %p2743_p0 }
  0x33   : > { %2457 = dma.hbm_to_vmem [thread:$0]  (!%p3117_p11), %s3907_s2, 2048, %s255_s22, [#allocation11], %s3871_s16, %s3871_s16, %s3873_s21  }
  0x34   : > { %p2751_p10 = pnand %p2750_p8, %p2744_p4 }
  0x36   : > { %2754 = shalt.err (!%p2751_p10)
}
  0x37   : > { %s2965_s26 = smov 256   ;;  %s2966_s19 = smov 16  }
  0x38   : > { %s3908_s4 = sld [smem:[#allocation35_spill]]  ;;  %p229_p12 = scmp.eq.s32.totalorder %s3084_s15, 7 }
  0x39   : > { %s41_s24 = sadd.s32 1, %s2947_s11  ;;  %s44_s16 = sadd.s32 1, %s2951_s12 }
  0x3a   : > { %p42_p13 = scmp.ge.s32.totalorder %s41_s24, 2  ;;  %s48_s21 = sadd.s32 1, %s2955_s13 }
  0x3b   : > { %p64_p0 = scmp.ne.s32.totalorder %s2931_s8, %s2927_s30  ;;  %s57_s23 = sadd.s32 1, %s2931_s8 }
  0x3c   : > { %s3956_s24 = smov (%p42_p13, %s41_s24), 0  ;;  %s3958_s16 = smov (!%p42_p13, %s44_s16), %s2951_s12 }
  0x3d   : > { %3909 = sst [smem:[#allocation29_spill]] %s3956_s24  ;;  %p3887_p4 = scmp.eq.s32.totalorder %s2959_s14, 0 }
  0x3e   : > { %2460 = dma.hbm_to_vmem [thread:$0]  (!%p3117_p11), %s3908_s4, 4096, %s271_s25, [#allocation14], %s2965_s26, %s2965_s26, %s2966_s19  }
  0x3f   : > { %p46_p11 = scmp.ge.s32.totalorder %s3958_s16, 2  ;;  %p3153_p2 = por %p229_p12, %p64_p0 }
  0x40   : > { %p3159_p6 = por %p3887_p4, %p64_p0  ;;  %s81_s19 = ssub.s32 %s2947_s11, %s3956_s24 }
  0x41   : > { %s3910_s25 = scalar_select %p3153_p2, 1, 0 }
  0x42   : > { %s3960_s16 = smov (%p46_p11, %s3958_s16), 0  ;;  %s3962_s21 = smov (!%p46_p11, %s48_s21), %s2955_s13 }
  0x43   : > { %3911 = sst [smem:[#allocation30_spill]] %s3910_s25  ;;  %p3888_p8 = scmp.lt.s32.totalorder %s2959_s14, 8 }
  0x44   : > { %3913 = sst [smem:[#allocation31_spill]] %s3960_s16  ;;  %s290_s22 = sand.u32 1, %s2931_s8  }
  0x45   : > { %p50_p10 = scmp.ge.s32.totalorder %s3962_s21, 2  ;;  %s53_s29 = ssub.s32 %s2951_s12, %s3960_s16 }
  0x46   : > { %s2096_s2 = sshll.u32 %s290_s22, 7  ;;  %s2097_s4 = sshll.u32 %s2951_s12, 4 }
  0x47   : > { %s3964_s21 = smov (%p50_p10, %s3962_s21), 0  ;;  %s2098_s7 = sshll.u32 %s2955_s13, 5 }
  0x48   : > { %3914 = sst [smem:[#allocation32_spill]] %s3964_s21  ;;  %s52_s25 = ssub.s32 %s2955_s13, %s3964_s21 }
  0x49   : > { %s300_s24 = sadd.s32 %s2098_s7, %s2097_s4  ;;  %s54_s10 = sor.u32 %s53_s29, %s52_s25 }
  0x4a   : > { %p55_p12 = scmp.eq.s32.totalorder %s54_s10, 0  ;;  %s3178_s9 = sor.u32 %s81_s19, %s52_s25 }
  0x4b   : > { %s2099_s5 = sshll.u32 %s300_s24, 7  ;;  %s294_s3 = scalar_lea.vmem [#allocation7], %s2096_s2 }
  0x4c   : > { %s303_s6 = sshll.u32 %s294_s3, 4  ;;  %s302_s12 = scalar_lea.hbm %s3861_s0, %s2099_s5  ;;  %s304_s6 = int_to_ptr.vmem [resolvable:$true] %s303_s6 }
  0x4d   : > { %s3181_s16 = scalar_select %p55_p12, %s2931_s8, %s57_s23  }
  0x4e   : > { %p3190_p13 = pnand %p3888_p8, %p3159_p6  ;;  %s2101_s4 = sshll.u32 %s2947_s11, 4 }
  0x4f   : > { %s323_s10 = sadd.s32 %s2101_s4, %s2098_s7  ;;  %p83_p0 = scmp.eq.s32.totalorder %s3178_s9, 0 }
  0x50   : > { %s291_s24 = scalar_lea.sflag [#allocation8], %s290_s22  ;;  %p2757_p11 = pneg %p3190_p13 }
  0x51   : > { %s2768_s2 = scalar_lea.vmem %s304_s6, 2048  ;;  %s2967_s3 = smov [#allocation7]  }
  0x52   : > { %p2769_p10 = scmp.ne.s32.totalorder %s304_s6, %s2768_s2  ;;  %s2773_s5 = sshll.u32 %s2967_s3, 4  ;;  %s2774_s5 = int_to_ptr.vmem [resolvable:$false] %s2773_s5 }
  0x53   : > { %s2775_s15 = scalar_lea.vmem %s2774_s5, 4096  ;;  %p2776_p4 = scmp.lt.s32.totalorder %s304_s6, %s2774_s5 }
  0x54   : > { %p2771_p12 = pnand %p2769_p10, %p2757_p11  ;;  %p2777_p6 = scmp.lt.s32.totalorder %s2775_s15, %s2768_s2 }
  0x56   : > { %p2772_p1 = pneg %p2771_p12  ;;  %p2778_p8 = por %p2777_p6, %p2776_p4 }
  0x58   : > { %p2779_p7 = pnand %p2778_p8, %p2772_p1 }
  0x5a   : > { %2782 = shalt.err (!%p2779_p7)
}
  0x5b   : > { %s3916_s7 = smov 8   ;;  %s3917_s18 = smov 128  }
  0x5c   : > { %2464 = dma.hbm_to_vmem [thread:$0]  (!%p3190_p13), %s302_s12, 2048, %s304_s6, %s291_s24, %s3917_s18, %s3917_s18, %s3916_s7  }
  0x5d   : > { %s2103_s23 = sshll.u32 %s323_s10, 7  ;;  %s85_s25 = sadd.s32 1, %s2919_s28 }
  0x5e   : > { %p92_p4 = scmp.ne.s32.totalorder %s2919_s28, %s2915_s27  ;;  %p3918_p1 = scmp.eq.s32.totalorder %s2959_s14, 0 }
  0x5f   : > { %s3209_s26 = scalar_select %p83_p0, %s2919_s28, %s85_s25  }
  0x60   : > { %p94_p7 = por %p92_p4, %p3918_p1  ;;  %s313_s21 = sand.u32 1, %s2959_s14  }
  0x61   : > { %s325_s29 = scalar_lea.hbm %s3862_s1, %s2103_s23  ;;  %s315_s4 = sand.u32 1, %s2919_s28  }
  0x62   : > { %s2100_s2 = sshll.u32 %s315_s4, 7  ;;  %p3919_p8 = scmp.lt.s32.totalorder %s2959_s14, 8 }
  0x63   : > { %s317_s6 = scalar_lea.vmem [#allocation10], %s2100_s2  ;;  %s314_s9 = scalar_lea.sflag [#allocation11], %s313_s21 }
  0x64   : > { %p3220_p11 = pnand %p3919_p8, %p94_p7  ;;  %s326_s12 = sshll.u32 %s317_s6, 4  ;;  %s327_s12 = int_to_ptr.vmem [resolvable:$true] %s326_s12 }
  0x65   : > { %s2796_s10 = scalar_lea.vmem %s327_s12, 2048  ;;  %s2968_s24 = smov [#allocation10]  }
  0x66   : > { %p2785_p13 = pneg %p3220_p11  ;;  %p2797_p0 = scmp.ne.s32.totalorder %s327_s12, %s2796_s10 }
  0x67   : > { %s2801_s5 = sshll.u32 %s2968_s24, 4  ;;  %s2802_s5 = int_to_ptr.vmem [resolvable:$false] %s2801_s5 }
  0x68   : > { %p2799_p10 = pnand %p2797_p0, %p2785_p13  ;;  %s2803_s15 = scalar_lea.vmem %s2802_s5, 4096 }
  0x69   : > { %p2804_p6 = scmp.lt.s32.totalorder %s327_s12, %s2802_s5  ;;  %p2805_p4 = scmp.lt.s32.totalorder %s2803_s15, %s2796_s10 }
  0x6a   : > { %p2800_p12 = pneg %p2799_p10 }
  0x6b   : > { %p2806_p1 = por %p2805_p4, %p2804_p6 }
  0x6d   : > { %p2807_p7 = pnand %p2806_p1, %p2800_p12 }
  0x6f   : > { %2810 = shalt.err (!%p2807_p7)
}
  0x70   : > { %2467 = dma.hbm_to_vmem [thread:$0]  (!%p3220_p11), %s325_s29, 2048, %s327_s12, %s314_s9, %s3917_s18, %s3917_s18, %s3916_s7  }
  0x71   : > { %338 = sbr.rel (%p3109_p9) target bundleno = 1674 (0x68a), region = 48  ;;  %s3234_s23 = sand.u32 (!%p3109_p9), 1, %s2927_s30  }
  0x72   : > { %s2105_s25 = sshll.u32 (!%p3109_p9), %s3234_s23, 7  ;;  %s341_s21 = scalar_lea.sflag (!%p3109_p9), [#allocation8], %s3234_s23 }
  0x73   : > { %s3238_s19 = scalar_lea.vmem (!%p3109_p9), [#allocation7], %s2105_s25 }
  0x76   : > { %2890 = dma.done.wait (%p3093_p3), %s341_s21, 2048  }
  0x77   : > { %2892 = vsyncadd (%p3093_p3), %s341_s21, 4294965248  ;;  %s3921_s22 = sld [smem:[#allocation26_spill]]  ;;  %s351_s18 = sand.u32 1, %s2915_s27  }
  0x78   : > { %s2106_s29 = sshll.u32 %s351_s18, 7 }
  0x79   : > { %s3246_s2 = scalar_lea.vmem [#allocation10], %s2106_s29 }
  0x7d   : > { %s349_s20 = sand.u32 1, %s3921_s22  }
  0x7e   : > { %s350_s4 = scalar_lea.sflag [#allocation11], %s349_s20 }
  0x7f   : > { %2894 = dma.done.wait (%p3099_p5), %s350_s4, 2048  }
  0x80   : > { %2896 = vsyncadd (%p3099_p5), %s350_s4, 4294965248  ;;  %p3923_p9 = scmp.eq.s32.totalorder %s3921_s22, 0 }
  0x82   : > { %2898 = dma.done.wait (%p3923_p9), [#allocation11], 2048   ;;  %p3924_p8 = pmov %p3923_p9 }
  0x84   : > { %2900 = vsyncadd (%p3924_p8), [#allocation11], 4294965248  ;;  %p3925_p3 = pmov %p3924_p8 }
  0x86   : > { %2902 = dma.done.wait (%p3925_p3), [#allocation14], 4096   ;;  %p3926_p11 = pmov %p3925_p3 }
  0x87   : > { %s3260_s17 = scalar_lea.vmem [#allocation15], %s2105_s25  ;;  %s3927_s3 = sld [smem:[#allocation22_spill]] }
  0x88   : > { %2904 = vsyncadd (%p3926_p11), [#allocation14], 4294963200 }
  0x8d   : > { %p2110_p13 = scmp.ne.s32.totalorder %s3927_s3, 0 }
  0x8e   : > { %s3928_s9 = sld [smem:[#allocation34_spill]] (!%p2110_p13) }
  0x8f   : > { %404 = sbr.rel (%p2110_p13) target bundleno = 394 (0x18a), region = 68 }
  0x94   : > { %vm405_vm0 = vcmask 7168   ;;  %v485_v1 = vld [vmem:[#allocation12 + $0x78] sm:$0xff]  ;;  %v484_v2 = vld [vmem:[#allocation12 + $0x70] sm:$0xff]  ;;  %v2969_v3 = vmov -inf   ;;  %v2970_v4 = vmov 0.0   ;;  %v483_v5 = vld [vmem:[#allocation12 + $0x68] sm:$0xff] }
  0x95   : > { %406 = vst.msk [vmem:[#allocation3] sm:$0xff] %vm405_vm0, %v2969_v3  ;;  %407 = vst.msk [vmem:[#allocation3 + $0x8] sm:$0xff] %vm405_vm0, %v2969_v3  ;;  %2270 = vmatprep.subr.mxu0 %v485_v1  ;;  %2390 = vmatprep.subr.mxu1 %v485_v1  ;;  %v482_v6 = vld [vmem:[#allocation12 + $0x60] sm:$0xff]  ;;  %v481_v7 = vld [vmem:[#allocation12 + $0x58] sm:$0xff] }
  0x96   : > { %408 = vst.msk [vmem:[#allocation3 + $0x10] sm:$0xff] %vm405_vm0, %v2969_v3  ;;  %409 = vst.msk [vmem:[#allocation3 + $0x18] sm:$0xff] %vm405_vm0, %v2969_v3  ;;  %2271 = vmatpush3.msra.mxu0 %v485_v1  ;;  %2406 = vmatpush3.msra.mxu1 %v485_v1  ;;  %v480_v8 = vld [vmem:[#allocation12 + $0x50] sm:$0xff]  ;;  %v479_v9 = vld [vmem:[#allocation12 + $0x48] sm:$0xff] }
  0x97   : > { %410 = vst.msk [vmem:[#allocation3 + $0x20] sm:$0xff] %vm405_vm0, %v2969_v3  ;;  %411 = vst.msk [vmem:[#allocation3 + $0x28] sm:$0xff] %vm405_vm0, %v2969_v3  ;;  %2272 = vmatprep.subr.mxu0 %v484_v2  ;;  %2391 = vmatprep.subr.mxu1 %v484_v2  ;;  %v478_v10 = vld [vmem:[#allocation12 + $0x40] sm:$0xff]  ;;  %v477_v11 = vld [vmem:[#allocation12 + $0x38] sm:$0xff] }
  0x98   : > { %412 = vst.msk [vmem:[#allocation3 + $0x30] sm:$0xff] %vm405_vm0, %v2969_v3  ;;  %413 = vst.msk [vmem:[#allocation3 + $0x38] sm:$0xff] %vm405_vm0, %v2969_v3  ;;  %2273 = vmatpush3.msra.mxu0 %v484_v2  ;;  %2407 = vmatpush3.msra.mxu1 %v484_v2  ;;  %v476_v12 = vld [vmem:[#allocation12 + $0x30] sm:$0xff]  ;;  %v475_v13 = vld [vmem:[#allocation12 + $0x28] sm:$0xff] }
  0x99   : > { %414 = vst.msk [vmem:[#allocation3 + $0x40] sm:$0xff] %vm405_vm0, %v2969_v3  ;;  %415 = vst.msk [vmem:[#allocation3 + $0x48] sm:$0xff] %vm405_vm0, %v2969_v3  ;;  %2274 = vmatprep.subr.mxu0 %v483_v5  ;;  %2392 = vmatprep.subr.mxu1 %v483_v5  ;;  %v474_v14 = vld [vmem:[#allocation12 + $0x20] sm:$0xff]  ;;  %v473_v15 = vld [vmem:[#allocation12 + $0x18] sm:$0xff] }
  0x9a   : > { %416 = vst.msk [vmem:[#allocation3 + $0x50] sm:$0xff] %vm405_vm0, %v2969_v3  ;;  %417 = vst.msk [vmem:[#allocation3 + $0x58] sm:$0xff] %vm405_vm0, %v2969_v3  ;;  %2275 = vmatpush3.msra.mxu0 %v483_v5  ;;  %2408 = vmatpush3.msra.mxu1 %v483_v5  ;;  %v472_v16 = vld [vmem:[#allocation12 + $0x10] sm:$0xff]  ;;  %v471_v17 = vld [vmem:[#allocation12 + $0x8] sm:$0xff] }
  0x9b   : > { %418 = vst.msk [vmem:[#allocation3 + $0x60] sm:$0xff] %vm405_vm0, %v2969_v3  ;;  %419 = vst.msk [vmem:[#allocation3 + $0x68] sm:$0xff] %vm405_vm0, %v2969_v3  ;;  %2276 = vmatprep.subr.mxu0 %v482_v6  ;;  %2393 = vmatprep.subr.mxu1 %v482_v6  ;;  %v470_v18 = vld [vmem:[#allocation12] sm:$0xff]  ;;  %v455_v21 = vld [vmem:[%s3238_s19 + $0x8] sm:$0xff] }
  0x9c   : > { %420 = vst.msk [vmem:[#allocation3 + $0x70] sm:$0xff] %vm405_vm0, %v2969_v3  ;;  %421 = vst.msk [vmem:[#allocation3 + $0x78] sm:$0xff] %vm405_vm0, %v2969_v3  ;;  %2277 = vmatpush3.msra.mxu0 %v482_v6  ;;  %2409 = vmatpush3.msra.mxu1 %v482_v6  ;;  %v454_v19 = vld [vmem:[%s3238_s19] sm:$0xff]  ;;  %v463_v22 = vld [vmem:[%s3238_s19 + $0x48] sm:$0xff] }
  0x9d   : > { %422 = vst.msk [vmem:[#allocation4] sm:$0xff] %vm405_vm0, %v2970_v4  ;;  %423 = vst.msk [vmem:[#allocation4 + $0x8] sm:$0xff] %vm405_vm0, %v2970_v4  ;;  %2278 = vmatprep.subr.mxu0 %v481_v7  ;;  %2394 = vmatprep.subr.mxu1 %v481_v7  ;;  %v462_v20 = vld [vmem:[%s3238_s19 + $0x40] sm:$0xff]  ;;  %v456_v23 = vld [vmem:[%s3238_s19 + $0x10] sm:$0xff] }
  0x9e   : > { %424 = vst.msk [vmem:[#allocation4 + $0x10] sm:$0xff] %vm405_vm0, %v2970_v4  ;;  %425 = vst.msk [vmem:[#allocation4 + $0x18] sm:$0xff] %vm405_vm0, %v2970_v4  ;;  %2279 = vmatpush3.msra.mxu0 %v481_v7  ;;  %2410 = vmatpush3.msra.mxu1 %v481_v7  ;;  %v464_v24 = vld [vmem:[%s3238_s19 + $0x50] sm:$0xff]  ;;  %v457_v25 = vld [vmem:[%s3238_s19 + $0x18] sm:$0xff] }
  0x9f   : > { %426 = vst.msk [vmem:[#allocation4 + $0x20] sm:$0xff] %vm405_vm0, %v2970_v4  ;;  %427 = vst.msk [vmem:[#allocation4 + $0x28] sm:$0xff] %vm405_vm0, %v2970_v4  ;;  %2280 = vmatprep.subr.mxu0 %v480_v8  ;;  %2395 = vmatprep.subr.mxu1 %v480_v8  ;;  %v465_v26 = vld [vmem:[%s3238_s19 + $0x58] sm:$0xff]  ;;  %v458_v27 = vld [vmem:[%s3238_s19 + $0x20] sm:$0xff] }
  0xa0   : > { %428 = vst.msk [vmem:[#allocation4 + $0x30] sm:$0xff] %vm405_vm0, %v2970_v4  ;;  %429 = vst.msk [vmem:[#allocation4 + $0x38] sm:$0xff] %vm405_vm0, %v2970_v4  ;;  %2281 = vmatpush3.msra.mxu0 %v480_v8  ;;  %2411 = vmatpush3.msra.mxu1 %v480_v8  ;;  %v466_v28 = vld [vmem:[%s3238_s19 + $0x60] sm:$0xff]  ;;  %v459_v29 = vld [vmem:[%s3238_s19 + $0x28] sm:$0xff] }
  0xa1   : > { %430 = vst.msk [vmem:[#allocation4 + $0x40] sm:$0xff] %vm405_vm0, %v2970_v4  ;;  %431 = vst.msk [vmem:[#allocation4 + $0x48] sm:$0xff] %vm405_vm0, %v2970_v4  ;;  %2282 = vmatprep.subr.mxu0 %v479_v9  ;;  %2396 = vmatprep.subr.mxu1 %v479_v9  ;;  %v467_v30 = vld [vmem:[%s3238_s19 + $0x68] sm:$0xff]  ;;  %v460_v31 = vld [vmem:[%s3238_s19 + $0x30] sm:$0xff] }
  0xa2   : > { %432 = vst.msk [vmem:[#allocation4 + $0x50] sm:$0xff] %vm405_vm0, %v2970_v4  ;;  %433 = vst.msk [vmem:[#allocation4 + $0x58] sm:$0xff] %vm405_vm0, %v2970_v4  ;;  %2283 = vmatpush3.msra.mxu0 %v479_v9  ;;  %2412 = vmatpush3.msra.mxu1 %v479_v9  ;;  %v468_v32 = vld [vmem:[%s3238_s19 + $0x70] sm:$0xff]  ;;  %v461_v33 = vld [vmem:[%s3238_s19 + $0x38] sm:$0xff] }
  0xa3   : > { %434 = vst.msk [vmem:[#allocation4 + $0x60] sm:$0xff] %vm405_vm0, %v2970_v4  ;;  %435 = vst.msk [vmem:[#allocation4 + $0x68] sm:$0xff] %vm405_vm0, %v2970_v4  ;;  %2284 = vmatprep.subr.mxu0 %v478_v10  ;;  %2397 = vmatprep.subr.mxu1 %v478_v10  ;;  %v469_v34 = vld [vmem:[%s3238_s19 + $0x78] sm:$0xff] }
  0xa4   : > { %436 = vst.msk [vmem:[#allocation4 + $0x70] sm:$0xff] %vm405_vm0, %v2970_v4  ;;  %437 = vst.msk [vmem:[#allocation4 + $0x78] sm:$0xff] %vm405_vm0, %v2970_v4  ;;  %2285 = vmatpush3.msra.mxu0 %v478_v10  ;;  %2413 = vmatpush3.msra.mxu1 %v478_v10  ;;  %v2111_v36 = vld [vmem:[%s3928_s9] ss:$0 sm:$0xff] }
  0xa5   : > { %438 = vst [vmem:[#allocation5 + $0x30] sm:$0xff] %v2970_v4  ;;  %439 = vst [vmem:[#allocation5] sm:$0xff] %v2970_v4  ;;  %2286 = vmatprep.subr.mxu0 %v477_v11  ;;  %2398 = vmatprep.subr.mxu1 %v477_v11 }
  0xa6   : > { %440 = vst [vmem:[#allocation5 + $0x58] sm:$0xff] %v2970_v4  ;;  %441 = vst [vmem:[#allocation5 + $0x18] sm:$0xff] %v2970_v4  ;;  %2287 = vmatpush3.msra.mxu0 %v477_v11  ;;  %2414 = vmatpush3.msra.mxu1 %v477_v11 }
  0xa7   : > { %442 = vst [vmem:[#allocation5 + $0x50] sm:$0xff] %v2970_v4  ;;  %443 = vst [vmem:[#allocation5 + $0x68] sm:$0xff] %v2970_v4  ;;  %2288 = vmatprep.subr.mxu0 %v476_v12  ;;  %2399 = vmatprep.subr.mxu1 %v476_v12 }
  0xa8   : > { %444 = vst [vmem:[#allocation5 + $0x8] sm:$0xff] %v2970_v4  ;;  %445 = vst [vmem:[#allocation5 + $0x48] sm:$0xff] %v2970_v4  ;;  %2289 = vmatpush3.msra.mxu0 %v476_v12  ;;  %2415 = vmatpush3.msra.mxu1 %v476_v12 }
  0xa9   : > { %446 = vst [vmem:[#allocation5 + $0x40] sm:$0xff] %v2970_v4  ;;  %447 = vst [vmem:[#allocation5 + $0x20] sm:$0xff] %v2970_v4  ;;  %2290 = vmatprep.subr.mxu0 %v475_v13  ;;  %2400 = vmatprep.subr.mxu1 %v475_v13 }
  0xaa   : > { %448 = vst [vmem:[#allocation5 + $0x10] sm:$0xff] %v2970_v4  ;;  %449 = vst [vmem:[#allocation5 + $0x38] sm:$0xff] %v2970_v4  ;;  %2291 = vmatpush3.msra.mxu0 %v475_v13  ;;  %2416 = vmatpush3.msra.mxu1 %v475_v13 }
  0xab   : > { %450 = vst [vmem:[#allocation5 + $0x60] sm:$0xff] %v2970_v4  ;;  %451 = vst [vmem:[#allocation5 + $0x70] sm:$0xff] %v2970_v4  ;;  %2292 = vmatprep.subr.mxu0 %v474_v14  ;;  %2401 = vmatprep.subr.mxu1 %v474_v14 }
  0xac   : > { %452 = vst [vmem:[#allocation5 + $0x78] sm:$0xff] %v2970_v4  ;;  %453 = vst [vmem:[#allocation5 + $0x28] sm:$0xff] %v2970_v4  ;;  %2293 = vmatpush3.msra.mxu0 %v474_v14  ;;  %2417 = vmatpush3.msra.mxu1 %v474_v14 }
  0xad   : > { %2294 = vmatprep.subr.mxu0 %v473_v15  ;;  %2402 = vmatprep.subr.mxu1 %v473_v15 }
  0xae   : > { %2295 = vmatpush3.msra.mxu0 %v473_v15  ;;  %2418 = vmatpush3.msra.mxu1 %v473_v15 }
  0xaf   : > { %2296 = vmatprep.subr.mxu0 %v472_v16  ;;  %2403 = vmatprep.subr.mxu1 %v472_v16 }
  0xb0   : > { %2297 = vmatpush3.msra.mxu0 %v472_v16  ;;  %2419 = vmatpush3.msra.mxu1 %v472_v16 }
  0xb1   : > { %2298 = vmatprep.subr.mxu0 %v471_v17  ;;  %2404 = vmatprep.subr.mxu1 %v471_v17 }
  0xb2   : > { %2299 = vmatpush3.msra.mxu0 %v471_v17  ;;  %2420 = vmatpush3.msra.mxu1 %v471_v17 }
  0xb3   : > { %2300 = vmatprep.subr.mxu0 %v470_v18  ;;  %2405 = vmatprep.subr.mxu1 %v470_v18 }
  0xb4   : > { %2301 = vmatpush3.msra.mxu0 %v470_v18  ;;  %2421 = vmatpush3.msra.mxu1 %v470_v18 }
  0xb5   : > { %2302 = vmatprep.mubr.f32.mxu0 %v454_v19  ;;  %2314 = vmatprep.mubr.f32.mxu1 %v462_v20 }
  0xb6   : > { %2303 = vmatmul.mubr.f32.vlgmr.msra.gmra.mxu0 %v455_v21  ;;  %2315 = vmatmul.mubr.f32.vlgmr.msra.gmra.mxu1 %v463_v22 }
  0xb7   : > { %2305 = vmatprep.mubr.f32.mxu0 %v456_v23  ;;  %2317 = vmatprep.mubr.f32.mxu1 %v464_v24 }
  0xba   : > { %2306 = vmatmul.mubr.f32.gmra.mxu0 %v457_v25  ;;  %2318 = vmatmul.mubr.f32.gmra.mxu1 %v465_v26 }
  0xbb   : > { %2308 = vmatprep.mubr.f32.mxu0 %v458_v27  ;;  %2320 = vmatprep.mubr.f32.mxu1 %v466_v28 }
  0xbe   : > { %2309 = vmatmul.mubr.f32.gmra.mxu0 %v459_v29  ;;  %2321 = vmatmul.mubr.f32.gmra.mxu1 %v467_v30 }
  0xbf   : > { %2311 = vmatprep.mubr.f32.mxu0 %v460_v31  ;;  %2323 = vmatprep.mubr.f32.mxu1 %v468_v32 }
  0xc2   : > { %2312 = vmatmul.mubr.f32.gmra.mxu0 %v461_v33  ;;  %2324 = vmatmul.mubr.f32.gmra.mxu1 %v469_v34 }
 0x176   : > { %v2304_v35 = vpop.f32.mrf.mxu0  ;;  %v2316_v37 = vpop.f32.mrf.mxu1 }
 0x177   : > { %v565_v40 = vadd.f32 %v2304_v35, %v2111_v36  ;;  %v605_v41 = vadd.f32 %v2316_v37, %v2111_v36 }
 0x178   : > { %v559_v38 = vpop.f32.mrf.mxu0  ;;  %v599_v39 = vpop.f32.mrf.mxu1 }
 0x179   : > { %v560_v42 = vadd.f32 %v2111_v36, %v559_v38  ;;  %v600_v43 = vadd.f32 %v2111_v36, %v599_v39 }
 0x17a   : > { %v2307_v44 = vpop.f32.mrf.mxu0  ;;  %v2319_v45 = vpop.f32.mrf.mxu1 }
 0x17b   : > { %v2162_v46 = vpack.c.bf16 %v565_v40, %v560_v42  ;;  %v2182_v47 = vpack.c.bf16 %v605_v41, %v600_v43  ;;  %v575_v50 = vadd.f32 %v2307_v44, %v2111_v36  ;;  %v615_v51 = vadd.f32 %v2319_v45, %v2111_v36 }
 0x17c   : > { %v569_v48 = vpop.f32.mrf.mxu0  ;;  %v609_v49 = vpop.f32.mrf.mxu1 }
 0x17d   : > { %2163 = vst [vmem:[#allocation2] sm:$0xff] %v2162_v46   ;;  %2202 = vst [vmem:[#allocation2 + $0x20] sm:$0xff] %v2182_v47   ;;  %v570_v52 = vadd.f32 %v2111_v36, %v569_v48  ;;  %v610_v53 = vadd.f32 %v2111_v36, %v609_v49 }
 0x17e   : > { %v2310_v54 = vpop.f32.mrf.mxu0  ;;  %v2322_v55 = vpop.f32.mrf.mxu1 }
 0x17f   : > { %v2167_v56 = vpack.c.bf16 %v575_v50, %v570_v52  ;;  %v2187_v57 = vpack.c.bf16 %v615_v51, %v610_v53  ;;  %v585_v60 = vadd.f32 %v2310_v54, %v2111_v36  ;;  %v625_v61 = vadd.f32 %v2322_v55, %v2111_v36 }
 0x180   : > { %v579_v58 = vpop.f32.mrf.mxu0  ;;  %v619_v59 = vpop.f32.mrf.mxu1 }
 0x181   : > { %2199 = vst [vmem:[#allocation2 + $0x8] sm:$0xff] %v2167_v56   ;;  %2203 = vst [vmem:[#allocation2 + $0x28] sm:$0xff] %v2187_v57   ;;  %v580_v62 = vadd.f32 %v2111_v36, %v579_v58  ;;  %v620_v63 = vadd.f32 %v2111_v36, %v619_v59 }
 0x182   : > { %v2313_v0 = vpop.f32.mrf.mxu0  ;;  %v2325_v1 = vpop.f32.mrf.mxu1 }
 0x183   : > { %v2172_v2 = vpack.c.bf16 %v585_v60, %v580_v62  ;;  %v2192_v3 = vpack.c.bf16 %v625_v61, %v620_v63  ;;  %v595_v6 = vadd.f32 %v2313_v0, %v2111_v36  ;;  %v635_v7 = vadd.f32 %v2325_v1, %v2111_v36 }
 0x184   : > { %v589_v4 = vpop.f32.mrf.mxu0  ;;  %v629_v5 = vpop.f32.mrf.mxu1 }
 0x185   : > { %2200 = vst [vmem:[#allocation2 + $0x10] sm:$0xff] %v2172_v2   ;;  %2204 = vst [vmem:[#allocation2 + $0x30] sm:$0xff] %v2192_v3   ;;  %v590_v8 = vadd.f32 %v2111_v36, %v589_v4  ;;  %v630_v9 = vadd.f32 %v2111_v36, %v629_v5 }
 0x187   : > { %v2177_v10 = vpack.c.bf16 %v595_v6, %v590_v8  ;;  %v2197_v11 = vpack.c.bf16 %v635_v7, %v630_v9 }
 0x189   : > { %2201 = vst [vmem:[#allocation2 + $0x18] sm:$0xff] %v2177_v10   ;;  %2205 = vst [vmem:[#allocation2 + $0x38] sm:$0xff] %v2197_v11  }
 0x18a PF: > { %v765_v12 = vld [vmem:[#allocation13 + $0xf8] sm:$0xff]  ;;  %v764_v13 = vld [vmem:[#allocation13 + $0xf0] sm:$0xff]  ;;  %v763_v14 = vld [vmem:[#allocation13 + $0xe8] sm:$0xff]  ;;  %v2971_v16 = vmov 0.0   ;;  %v768_v61 = vlaneseq  ;;  %s3929_s5 = sld [smem:[#allocation36_spill]]  ;;  %vm1436_vm1 = vcmask 7168  }
 0x18b   : > { %778 = vmatprep.subr.mxu0 %v765_v12  ;;  %v762_v15 = vld [vmem:[#allocation13 + $0xe0] sm:$0xff]  ;;  %842 = vmatprep.mubr.f32.mxu0 %v2971_v16  ;;  %v761_v17 = vld [vmem:[#allocation13 + $0xd8] sm:$0xff]  ;;  %v760_v18 = vld [vmem:[#allocation13 + $0xd0] sm:$0xff]  ;;  %s3930_s15 = sld [smem:[#allocation22_spill]] }
 0x18c   : > { %779 = vmatpush1.msra.mxu0 %v764_v13  ;;  %v759_v19 = vld [vmem:[#allocation13 + $0xc8] sm:$0xff]  ;;  %v758_v20 = vld [vmem:[#allocation13 + $0xc0] sm:$0xff]  ;;  %v757_v21 = vld [vmem:[#allocation13 + $0xb8] sm:$0xff]  ;;  %v769_v62 = vshrl.u32 %v768_v61, 7 }
 0x18d   : > { %780 = vmatprep.subr.mxu0 %v763_v14  ;;  %v756_v22 = vld [vmem:[#allocation13 + $0xb0] sm:$0xff]  ;;  %v755_v23 = vld [vmem:[#allocation13 + $0xa8] sm:$0xff]  ;;  %v754_v24 = vld [vmem:[#allocation13 + $0xa0] sm:$0xff] }
 0x18e   : > { %781 = vmatpush1.msra.mxu0 %v762_v15  ;;  %v753_v25 = vld [vmem:[#allocation13 + $0x98] sm:$0xff]  ;;  %v752_v26 = vld [vmem:[#allocation13 + $0x90] sm:$0xff]  ;;  %v751_v27 = vld [vmem:[#allocation13 + $0x88] sm:$0xff]  ;;  %v770_v0 = vsub.s32 0, %v769_v62  ;;  %v774_v2 = vsub.s32 1, %v769_v62 }
 0x18f   : > { %782 = vmatprep.subr.mxu0 %v761_v17  ;;  %v750_v28 = vld [vmem:[#allocation13 + $0x80] sm:$0xff]  ;;  %v749_v29 = vld [vmem:[#allocation13 + $0x78] sm:$0xff]  ;;  %v748_v30 = vld [vmem:[#allocation13 + $0x70] sm:$0xff] }
 0x190   : > { %783 = vmatpush1.msra.mxu0 %v760_v18  ;;  %v747_v31 = vld [vmem:[#allocation13 + $0x68] sm:$0xff]  ;;  %v746_v32 = vld [vmem:[#allocation13 + $0x60] sm:$0xff]  ;;  %v745_v33 = vld [vmem:[#allocation13 + $0x58] sm:$0xff] }
 0x191   : > { %784 = vmatprep.subr.mxu0 %v759_v19  ;;  %v744_v34 = vld [vmem:[#allocation13 + $0x50] sm:$0xff]  ;;  %v743_v35 = vld [vmem:[#allocation13 + $0x48] sm:$0xff]  ;;  %v742_v36 = vld [vmem:[#allocation13 + $0x40] sm:$0xff]  ;;  %p2136_p5 = scmp.ne.s32.totalorder %s3930_s15, 1 }
 0x192   : > { %785 = vmatpush1.msra.mxu0 %v758_v20  ;;  %v741_v37 = vld [vmem:[#allocation13 + $0x38] sm:$0xff]  ;;  %v740_v38 = vld [vmem:[#allocation13 + $0x30] sm:$0xff]  ;;  %v739_v39 = vld [vmem:[#allocation13 + $0x28] sm:$0xff] }
 0x193   : > { %786 = vmatprep.subr.mxu0 %v757_v21  ;;  %v738_v40 = vld [vmem:[#allocation13 + $0x20] sm:$0xff]  ;;  %v737_v41 = vld [vmem:[#allocation13 + $0x18] sm:$0xff]  ;;  %v736_v42 = vld [vmem:[#allocation13 + $0x10] sm:$0xff] }
 0x194   : > { %787 = vmatpush1.msra.mxu0 %v756_v22  ;;  %v735_v43 = vld [vmem:[#allocation13 + $0x8] sm:$0xff]  ;;  %v734_v44 = vld [vmem:[#allocation13] sm:$0xff]  ;;  %v720_v47 = vld [vmem:[%s3246_s2 + $0x10] sm:$0xff] }
 0x195   : > { %788 = vmatprep.subr.mxu0 %v755_v23  ;;  %v718_v45 = vld [vmem:[%s3246_s2] sm:$0xff]  ;;  %v719_v46 = vld [vmem:[%s3246_s2 + $0x8] sm:$0xff]  ;;  %v721_v48 = vld [vmem:[%s3246_s2 + $0x18] sm:$0xff] }
 0x196   : > { %789 = vmatpush1.msra.mxu0 %v754_v24  ;;  %v722_v49 = vld [vmem:[%s3246_s2 + $0x20] sm:$0xff]  ;;  %v723_v50 = vld [vmem:[%s3246_s2 + $0x28] sm:$0xff]  ;;  %v724_v51 = vld [vmem:[%s3246_s2 + $0x30] sm:$0xff] }
 0x197   : > { %790 = vmatprep.subr.mxu0 %v753_v25  ;;  %v725_v52 = vld [vmem:[%s3246_s2 + $0x38] sm:$0xff]  ;;  %v726_v53 = vld [vmem:[%s3246_s2 + $0x40] sm:$0xff]  ;;  %v727_v54 = vld [vmem:[%s3246_s2 + $0x48] sm:$0xff] }
 0x198   : > { %791 = vmatpush1.msra.mxu0 %v752_v26  ;;  %v728_v55 = vld [vmem:[%s3246_s2 + $0x50] sm:$0xff]  ;;  %v729_v56 = vld [vmem:[%s3246_s2 + $0x58] sm:$0xff]  ;;  %v730_v57 = vld [vmem:[%s3246_s2 + $0x60] sm:$0xff] }
 0x199   : > { %792 = vmatprep.subr.mxu0 %v751_v27  ;;  %v731_v58 = vld [vmem:[%s3246_s2 + $0x68] sm:$0xff]  ;;  %v732_v59 = vld [vmem:[%s3246_s2 + $0x70] sm:$0xff]  ;;  %v733_v60 = vld [vmem:[%s3246_s2 + $0x78] sm:$0xff] }
 0x19a   : > { %793 = vmatpush1.msra.mxu0 %v750_v28  ;;  %v2597_v63 = vld [vmem:[#allocation2] sm:$0xff]  }
 0x19b   : > { %794 = vmatprep.subr.mxu0 %v749_v29  ;;  %2342 = vmatprep.mubr.bf16.mxu1 %v2597_v63  ;;  %v766_v1 = vld [vmem:[%s3929_s5] sm:$0x3] }
 0x19c   : > { %795 = vmatpush1.msra.mxu0 %v748_v30  ;;  %v3349_v4 = vrot.slane %v766_v1, %v770_v0  ;;  %v3351_v6 = vrot.slane %v766_v1, %v774_v2 }
 0x19d   : > { %796 = vmatprep.subr.mxu0 %v747_v31 }
 0x19e   : > { %797 = vmatpush1.msra.mxu0 %v746_v32 }
 0x19f   : > { %798 = vmatprep.subr.mxu0 %v745_v33 }
 0x1a0   : > { %799 = vmatpush1.msra.mxu0 %v744_v34 }
 0x1a1   : > { %800 = vmatprep.subr.mxu0 %v743_v35 }
 0x1a2   : > { %801 = vmatpush1.msra.mxu0 %v742_v36 }
 0x1a3   : > { %802 = vmatprep.subr.mxu0 %v741_v37 }
 0x1a4   : > { %803 = vmatpush1.msra.mxu0 %v740_v38 }
 0x1a5   : > { %804 = vmatprep.subr.mxu0 %v739_v39 }
 0x1a6   : > { %805 = vmatpush1.msra.mxu0 %v738_v40 }
 0x1a7   : > { %806 = vmatprep.subr.mxu0 %v737_v41 }
 0x1a8   : > { %807 = vmatpush1.msra.mxu0 %v736_v42 }
 0x1a9   : > { %808 = vmatprep.subr.mxu0 %v735_v43 }
 0x1aa   : > { %809 = vmatpush1.msra.mxu0 %v734_v44 }
 0x1ab   : > { %843 = vmatmul.mubr.f32.vlgmr.msra.gmra.mxu0 %v718_v45 }
 0x1ac   : > { %848 = vmatprep.mubr.f32.mxu0 %v2971_v16 }
 0x1af   : > { %849 = vmatmul.mubr.f32.gmra.mxu0 %v719_v46 }
 0x1b0   : > { %854 = vmatprep.mubr.f32.mxu0 %v2971_v16 }
 0x1b3   : > { %855 = vmatmul.mubr.f32.gmra.mxu0 %v720_v47 }
 0x1b4   : > { %860 = vmatprep.mubr.f32.mxu0 %v2971_v16 }
 0x1b7   : > { %861 = vmatmul.mubr.f32.gmra.mxu0 %v721_v48 }
 0x1b8   : > { %866 = vmatprep.mubr.f32.mxu0 %v2971_v16 }
 0x1bb   : > { %867 = vmatmul.mubr.f32.gmra.mxu0 %v722_v49 }
 0x1bc   : > { %872 = vmatprep.mubr.f32.mxu0 %v2971_v16 }
 0x1bf   : > { %873 = vmatmul.mubr.f32.gmra.mxu0 %v723_v50 }
 0x1c0   : > { %878 = vmatprep.mubr.f32.mxu0 %v2971_v16 }
 0x1c3   : > { %879 = vmatmul.mubr.f32.gmra.mxu0 %v724_v51 }
 0x1c4   : > { %884 = vmatprep.mubr.f32.mxu0 %v2971_v16 }
 0x1c7   : > { %885 = vmatmul.mubr.f32.gmra.mxu0 %v725_v52 }
 0x1c8   : > { %890 = vmatprep.mubr.f32.mxu0 %v2971_v16 }
 0x1cb   : > { %891 = vmatmul.mubr.f32.gmra.mxu0 %v726_v53 }
 0x1cc   : > { %896 = vmatprep.mubr.f32.mxu0 %v2971_v16 }
 0x1cf   : > { %897 = vmatmul.mubr.f32.gmra.mxu0 %v727_v54 }
 0x1d0   : > { %902 = vmatprep.mubr.f32.mxu0 %v2971_v16 }
 0x1d3   : > { %903 = vmatmul.mubr.f32.gmra.mxu0 %v728_v55 }
 0x1d4   : > { %908 = vmatprep.mubr.f32.mxu0 %v2971_v16 }
 0x1d7   : > { %909 = vmatmul.mubr.f32.gmra.mxu0 %v729_v56 }
 0x1d8   : > { %914 = vmatprep.mubr.f32.mxu0 %v2971_v16 }
 0x1db   : > { %915 = vmatmul.mubr.f32.gmra.mxu0 %v730_v57 }
 0x1dc   : > { %920 = vmatprep.mubr.f32.mxu0 %v2971_v16 }
 0x1df   : > { %921 = vmatmul.mubr.f32.gmra.mxu0 %v731_v58 }
 0x1e0   : > { %926 = vmatprep.mubr.f32.mxu0 %v2971_v16 }
 0x1e3   : > { %927 = vmatmul.mubr.f32.gmra.mxu0 %v732_v59 }
 0x1e4   : > { %932 = vmatprep.mubr.f32.mxu0 %v2971_v16 }
 0x1e7   : > { %933 = vmatmul.mubr.f32.gmra.mxu0 %v733_v60 }
 0x26b   : > { %v844_v3 = vpop.f32.mrf.mxu0 }
 0x26c   : > { %v845_v8 = vadd.f32 %v844_v3, %v3349_v4 }
 0x26d   : > { %v846_v5 = vpop.f32.mrf.mxu0 }
 0x26e   : > { %v847_v11 = vadd.f32 %v846_v5, %v3351_v6 }
 0x26f   : > { %v850_v7 = vpop.f32.mrf.mxu0 }
 0x270   : > { %v851_v9 = vadd.f32 %v850_v7, %v3349_v4 }
 0x271   : > { %v852_v10 = vpop.f32.mrf.mxu0 }
 0x272   : > { %v3356_v12 = vpack.c.bf16 %v851_v9, %v845_v8  ;;  %v853_v13 = vadd.f32 %v852_v10, %v3351_v6 }
 0x273   : > { %v856_v14 = vpop.f32.mrf.mxu0 }
 0x274   : > { %v3359_v15 = vpack.c.bf16 %v853_v13, %v847_v11  ;;  %v857_v18 = vadd.f32 %v856_v14, %v3349_v4 }
 0x275   : > { %v858_v16 = vpop.f32.mrf.mxu0 }
 0x276   : > { %v859_v21 = vadd.f32 %v858_v16, %v3351_v6 }
 0x277   : > { %v862_v17 = vpop.f32.mrf.mxu0 }
 0x278   : > { %v863_v19 = vadd.f32 %v862_v17, %v3349_v4 }
 0x279   : > { %v864_v20 = vpop.f32.mrf.mxu0 }
 0x27a   : > { %v3364_v22 = vpack.c.bf16 %v863_v19, %v857_v18  ;;  %v865_v23 = vadd.f32 %v864_v20, %v3351_v6 }
 0x27b   : > { %v868_v24 = vpop.f32.mrf.mxu0 }
 0x27c   : > { %v3367_v25 = vpack.c.bf16 %v865_v23, %v859_v21  ;;  %v869_v28 = vadd.f32 %v868_v24, %v3349_v4 }
 0x27d   : > { %v3369_v26 = vpop.f32.mrf.mxu0 }
 0x27e   : > { %v871_v19 = vadd.f32 %v3369_v26, %v3351_v6  ;;  %v2600_v26 = vld [vmem:[#allocation2 + $0x18] sm:$0xff]  }
 0x27f   : > { %v874_v27 = vpop.f32.mrf.mxu0 }
 0x280   : > { %v875_v29 = vadd.f32 %v874_v27, %v3349_v4 }
 0x281   : > { %v876_v30 = vpop.f32.mrf.mxu0 }
 0x282   : > { %v3373_v31 = vpack.c.bf16 %v875_v29, %v869_v28  ;;  %v877_v16 = vadd.f32 %v876_v30, %v3351_v6  ;;  %v2601_v28 = vld [vmem:[#allocation2 + $0x20] sm:$0xff]   ;;  %v2603_v29 = vld [vmem:[#allocation2 + $0x30] sm:$0xff]  }
 0x283   : > { %v3375_v32 = vpop.f32.mrf.mxu0 }
 0x284   : > { %v949_v21 = vpack.c.bf16 %v877_v16, %v871_v19  ;;  %v881_v24 = vadd.f32 %v3375_v32, %v3349_v4 }
 0x285   : > { %v882_v33 = vpop.f32.mrf.mxu0 }
 0x286   : > { %v883_v13 = vadd.f32 %v882_v33, %v3351_v6 }
 0x287   : > { %v3377_v34 = vpop.f32.mrf.mxu0 }
 0x288   : > { %v887_v23 = vadd.f32 %v3377_v34, %v3349_v4 }
 0x289   : > { %v888_v35 = vpop.f32.mrf.mxu0 }
 0x28a   : > { %v889_v10 = vadd.f32 %v888_v35, %v3351_v6  ;;  %v942_v27 = vpack.c.bf16 %v887_v23, %v881_v24  ;;  %v2972_v35 = vmov 0  }
 0x28b   : > { %v892_v36 = vpop.f32.mrf.mxu0  ;;  %2595 = vset.pattern.permute.xlu1 %v2972_v35  ;;  %2596 = vset.pattern.permute.xlu0 %v2972_v35 }
 0x28c   : > { %v950_v17 = vpack.c.bf16 %v889_v10, %v883_v13  ;;  %v893_v18 = vadd.f32 %v892_v36, %v3349_v4 }
 0x28d   : > { %v894_v37 = vpop.f32.mrf.mxu0 }
 0x28e   : > { %v895_v8 = vadd.f32 %v894_v37, %v3351_v6 }
 0x28f   : > { %v898_v38 = vpop.f32.mrf.mxu0 }
 0x290   : > { %v899_v14 = vadd.f32 %v898_v38, %v3349_v4 }
 0x291   : > { %v900_v39 = vpop.f32.mrf.mxu0 }
 0x292   : > { %v901_v3 = vadd.f32 %v900_v39, %v3351_v6  ;;  %v943_v20 = vpack.c.bf16 %v899_v14, %v893_v18  ;;  %v3523_v14 = vld [vmem:[#allocation3 + $0x58] sm:$0xff]  ;;  %v3531_v18 = vld [vmem:[#allocation3 + $0x60] sm:$0xff] }
 0x293   : > { %v904_v40 = vpop.f32.mrf.mxu0 }
 0x294   : > { %v905_v5 = vadd.f32 %v904_v40, %v3349_v4  ;;  %v951_v11 = vpack.c.bf16 %v901_v3, %v895_v8  ;;  %v3509_v8 = vld [vmem:[#allocation3 + $0x40] sm:$0xff] }
 0x295   : > { %v906_v41 = vpop.f32.mrf.mxu0 }
 0x296   : > { %v907_v1 = vadd.f32 %v906_v41, %v3351_v6 }
 0x297   : > { %v910_v42 = vpop.f32.mrf.mxu0 }
 0x298   : > { %v911_v2 = vadd.f32 %v910_v42, %v3349_v4 }
 0x299   : > { %v912_v43 = vpop.f32.mrf.mxu0 }
 0x29a   : > { %v913_v63 = vadd.f32 %v912_v43, %v3351_v6  ;;  %v944_v9 = vpack.c.bf16 %v911_v2, %v905_v5 }
 0x29b   : > { %v916_v44 = vpop.f32.mrf.mxu0 }
 0x29c   : > { %v917_v54 = vadd.f32 %v916_v44, %v3349_v4  ;;  %v952_v7 = vpack.c.bf16 %v913_v63, %v907_v1  ;;  %v3493_v63 = vld [vmem:[#allocation3 + $0x20] sm:$0xff] }
 0x29d   : > { %v918_v45 = vpop.f32.mrf.mxu0 }
 0x29e   : > { %v919_v60 = vadd.f32 %v918_v45, %v3351_v6  ;;  %v3466_v45 = vld [vmem:[#allocation3 + $0x10] sm:$0xff] }
 0x29f   : > { %v922_v46 = vpop.f32.mrf.mxu0 }
 0x2a0   : > { %v923_v51 = vadd.f32 %v922_v46, %v3349_v4 }
 0x2a1   : > { %v924_v47 = vpop.f32.mrf.mxu0 }
 0x2a2   : > { %v925_v56 = vadd.f32 %v924_v47, %v3351_v6  ;;  %v945_v61 = vpack.c.bf16 %v923_v51, %v917_v54  ;;  %v3477_v54 = vld [vmem:[#allocation3 + $0x8] sm:$0xff] }
 0x2a3   : > { %v928_v48 = vpop.f32.mrf.mxu0 }
 0x2a4   : > { %v929_v52 = vadd.f32 %v928_v48, %v3349_v4  ;;  %v953_v0 = vpack.c.bf16 %v925_v56, %v919_v60  ;;  %v1116_v48 = vld [vmem:[#allocation3] sm:$0xff] }
 0x2a5   : > { %v930_v49 = vpop.f32.mrf.mxu0 }
 0x2a6   : > { %v931_v57 = vadd.f32 %v930_v49, %v3351_v6  ;;  %v3471_v49 = vld [vmem:[#allocation3 + $0x18] sm:$0xff] }
 0x2a7   : > { %v934_v50 = vpop.f32.mrf.mxu0 }
 0x2a8   : > { %v935_v53 = vadd.f32 %v934_v50, %v3349_v4  ;;  %v2598_v4 = vld [vmem:[#allocation2 + $0x8] sm:$0xff]  }
 0x2a9   : > { %v936_v55 = vpop.f32.mrf.mxu0 }
 0x2aa   : > { %v937_v58 = vadd.f32 %v936_v55, %v3351_v6  ;;  %v946_v59 = vpack.c.bf16 %v935_v53, %v929_v52  ;;  %v2599_v6 = vld [vmem:[#allocation2 + $0x10] sm:$0xff]  }
 0x2ac   : > { %v954_v62 = vpack.c.bf16 %v937_v58, %v931_v57  ;;  %2326 = vmatprep.subr.bf16.mxu1 %v946_v59  ;;  %v3482_v57 = vld [vmem:[#allocation3 + $0x30] sm:$0xff]  ;;  %v3484_v58 = vld [vmem:[#allocation3 + $0x38] sm:$0xff] }
 0x2ad   : > { %2327 = vmatpush3.bf16.xpose.msra.mxu1 %v946_v59 }
 0x2ae   : > { %2328 = vmatprep.subr.bf16.mxu1 %v945_v61  ;;  %2358 = vmatprep.subr.bf16.mxu0 %v954_v62 }
 0x2af   : > { %2359 = vmatpush3.bf16.msra.mxu0 %v954_v62 }
 0x2b0   : > { %2360 = vmatprep.subr.bf16.mxu0 %v953_v0 }
 0x2b3   : > { %2361 = vmatpush3.bf16.msra.mxu0 %v953_v0 }
 0x2b4   : > { %2362 = vmatprep.subr.bf16.mxu0 %v952_v7 }
 0x2b5   : > { %2329 = vmatpush3.bf16.xpose.msra.mxu1 %v945_v61 }
 0x2b6   : > { %2330 = vmatprep.subr.bf16.mxu1 %v944_v9 }
 0x2b7   : > { %2363 = vmatpush3.bf16.msra.mxu0 %v952_v7 }
 0x2b8   : > { %2364 = vmatprep.subr.bf16.mxu0 %v951_v11 }
 0x2bb   : > { %2365 = vmatpush3.bf16.msra.mxu0 %v951_v11 }
 0x2bc   : > { %2366 = vmatprep.subr.bf16.mxu0 %v950_v17 }
 0x2bd   : > { %2331 = vmatpush3.bf16.xpose.msra.mxu1 %v944_v9 }
 0x2be   : > { %2332 = vmatprep.subr.bf16.mxu1 %v943_v20 }
 0x2bf   : > { %2367 = vmatpush3.bf16.msra.mxu0 %v950_v17 }
 0x2c0   : > { %2368 = vmatprep.subr.bf16.mxu0 %v949_v21 }
 0x2c3   : > { %2369 = vmatpush3.bf16.msra.mxu0 %v949_v21 }
 0x2c4   : > { %2370 = vmatprep.subr.bf16.mxu0 %v3367_v25 }
 0x2c5   : > { %2333 = vmatpush3.bf16.xpose.msra.mxu1 %v943_v20  ;;  %v3534_v20 = vld [vmem:[#allocation3 + $0x48] sm:$0xff] }
 0x2c6   : > { %2334 = vmatprep.subr.bf16.mxu1 %v942_v27 }
 0x2c7   : > { %2371 = vmatpush3.bf16.msra.mxu0 %v3367_v25 }
 0x2c8   : > { %2372 = vmatprep.subr.bf16.mxu0 %v3359_v15 }
 0x2cb   : > { %2373 = vmatpush3.bf16.msra.mxu0 %v3359_v15 }
 0x2cd   : > { %2335 = vmatpush3.bf16.xpose.msra.mxu1 %v942_v27 }
 0x2ce   : > { %2336 = vmatprep.subr.bf16.mxu1 %v3373_v31 }
 0x2d5   : > { %2337 = vmatpush3.bf16.xpose.msra.mxu1 %v3373_v31 }
 0x2d6   : > { %2338 = vmatprep.subr.bf16.mxu1 %v3364_v22 }
 0x2dd   : > { %2339 = vmatpush3.bf16.xpose.msra.mxu1 %v3364_v22  ;;  %v2602_v22 = vld [vmem:[#allocation2 + $0x28] sm:$0xff]  }
 0x2de   : > { %2340 = vmatprep.subr.bf16.mxu1 %v3356_v12 }
 0x2e5   : > { %2341 = vmatpush3.bf16.xpose.msra.mxu1 %v3356_v12  ;;  %v2604_v12 = vld [vmem:[#allocation2 + $0x38] sm:$0xff]  }
 0x2e6   : > { %2422 = vmatprep.subr.bf16.mxu1 %v954_v62 }
 0x2ec   : > { %2343 = vmatmul.mubr.bf16.vlgmr.msra.gmra.mxu1 %v2598_v4 }
 0x2ed   : > { %2430 = vmatpush3.bf16.msra.mxu1 %v954_v62  ;;  %2346 = vmatprep.mubr.bf16.mxu1 %v2599_v6  ;;  %v3542_v6 = vld [vmem:[#allocation3 + $0x70] sm:$0xff] }
 0x2ee   : > { %2423 = vmatprep.subr.bf16.mxu1 %v953_v0 }
 0x2f1   : > { %2431 = vmatpush3.bf16.msra.mxu1 %v953_v0  ;;  %v3495_v0 = vld [vmem:[#allocation3 + $0x28] sm:$0xff] }
 0x2f2   : > { %2424 = vmatprep.subr.bf16.mxu1 %v952_v7 }
 0x2f4   : > { %2347 = vmatmul.mubr.bf16.gmra.mxu1 %v2600_v26 }
 0x2f5   : > { %2432 = vmatpush3.bf16.msra.mxu1 %v952_v7  ;;  %2350 = vmatprep.mubr.bf16.mxu1 %v2601_v28  ;;  %v3507_v7 = vld [vmem:[#allocation3 + $0x50] sm:$0xff] }
 0x2f6   : > { %2425 = vmatprep.subr.bf16.mxu1 %v951_v11 }
 0x2f9   : > { %2433 = vmatpush3.bf16.msra.mxu1 %v951_v11 }
 0x2fa   : > { %2426 = vmatprep.subr.bf16.mxu1 %v950_v17 }
 0x2fc   : > { %2351 = vmatmul.mubr.bf16.gmra.mxu1 %v2602_v22 }
 0x2fd   : > { %2434 = vmatpush3.bf16.msra.mxu1 %v950_v17  ;;  %2354 = vmatprep.mubr.bf16.mxu1 %v2603_v29  ;;  %v3548_v29 = vld [vmem:[#allocation3 + $0x78] sm:$0xff] }
 0x2fe   : > { %2427 = vmatprep.subr.bf16.mxu1 %v949_v21 }
 0x301   : > { %2435 = vmatpush3.bf16.msra.mxu1 %v949_v21 }
 0x302   : > { %2428 = vmatprep.subr.bf16.mxu1 %v3367_v25 }
 0x304   : > { %2355 = vmatmul.mubr.bf16.gmra.mxu1 %v2604_v12 }
 0x305   : > { %2436 = vmatpush3.bf16.msra.mxu1 %v3367_v25 }
 0x306   : > { %2429 = vmatprep.subr.bf16.mxu1 %v3359_v15 }
 0x309   : > { %2437 = vmatpush3.bf16.msra.mxu1 %v3359_v15 }
 0x3ac   : > { %v3418_v30 = vpop.f32.mrf.mxu1 }
 0x3ad   : > { %1136 = vmax.xlane.f32.xlu0 %v3418_v30 }
 0x3ae   : > { %v3421_v31 = vpop.f32.mrf.mxu1 }
 0x3b0   : > { %v3423_v32 = vpop.f32.mrf.mxu1 }
 0x3b1   : > { %1132 = vmax.xlane.f32.xlu0 %v3421_v31  ;;  %1138 = vmax.xlane.f32.xlu1 %v3423_v32 }
 0x3b2   : > { %v3427_v33 = vpop.f32.mrf.mxu1 }
 0x3b4   : > { %v3429_v34 = vpop.f32.mrf.mxu1 }
 0x3b5   : > { %1134 = vmax.xlane.f32.xlu0 %v3427_v33 }
 0x3b6   : > { %v3432_v25 = vpop.f32.mrf.mxu1 }
 0x3b8   : > { %v3434_v15 = vpop.f32.mrf.mxu1 }
 0x3b9   : > { %1144 = vmax.xlane.f32.xlu0 %v3429_v34  ;;  %1146 = vmax.xlane.f32.xlu1 %v3434_v15 }
 0x3ba   : > { %v3438_v36 = vpop.f32.mrf.mxu1 }
 0x3bc   : > { %v3440_v37 = vpop.f32.mrf.mxu1 }
 0x3bd   : > { %1140 = vmax.xlane.f32.xlu0 %v3432_v25  ;;  %1142 = vmax.xlane.f32.xlu1 %v3438_v36 }
 0x3be   : > { %v3444_v38 = vpop.f32.mrf.mxu1 }
 0x3c0   : > { %v3446_v39 = vpop.f32.mrf.mxu1 }
 0x3c1   : > { %1152 = vmax.xlane.f32.xlu0 %v3440_v37  ;;  %1148 = vmax.xlane.f32.xlu1 %v3444_v38 }
 0x3c2   : > { %v3450_v40 = vpop.f32.mrf.mxu1 }
 0x3c4   : > { %v3452_v41 = vpop.f32.mrf.mxu1 }
 0x3c5   : > { %1154 = vmax.xlane.f32.xlu1 %v3446_v39 }
 0x3c6   : > { %v3455_v42 = vpop.f32.mrf.mxu1 }
 0x3c7   : > { %1156 = vmax.xlane.f32.xlu0 %v3455_v42 }
 0x3c8   : > { %v3460_v43 = vpop.f32.mrf.mxu1 }
 0x3c9   : > { %1150 = vmax.xlane.f32.xlu1 %v3450_v40 }
 0x3ca   : > { %v3463_v44 = vpop.f32.mrf.mxu1 }
 0x3cb   : > { %1160 = vmax.xlane.f32.xlu0 %v3452_v41 }
 0x3cd   : > { %1162 = vmax.xlane.f32.xlu1 %v3460_v43 }
 0x3d1   : > { %1158 = vmax.xlane.f32.xlu1 %v3463_v44 }
 0x436   : > { %v1137_v46 = vpop.xlane.xlu0 %1136 }
 0x437   : > { %v3469_v47 = vmax.f32 %v3466_v45, %v1137_v46 }
 0x439   : > { %1704 = vst.msk [vmem:[#allocation3 + $0x10] sm:$0xff] %vm1436_vm1, %v3469_v47  ;;  %1240 = vperm.xlu1 %2595, %v3469_v47   ;;  %v1182_v35 = vsub.f32 %v3466_v45, %v3469_v47 }
 0x43a   : > { %v1133_v50 = vpop.xlane.xlu0 %1132  ;;  %v1139_v51 = vpop.xlane.xlu1 %1138 }
 0x43b   : > { %v1164_v52 = vmax.f32 %v1116_v48, %v1133_v50  ;;  %v1167_v53 = vmax.f32 %v3471_v49, %v1139_v51  ;;  %v1200_v47 = vmul.f32 1.442695, %v1182_v35 }
 0x43d   : > { %1702 = vst.msk [vmem:[#allocation3] sm:$0xff] %vm1436_vm1, %v1164_v52  ;;  %1705 = vst.msk [vmem:[#allocation3 + $0x18] sm:$0xff] %vm1436_vm1, %v1167_v53  ;;  %1230 = vperm.xlu0 %2596, %v1164_v52   ;;  %1245 = vperm.xlu1 %2595, %v1167_v53   ;;  %v1180_v16 = vsub.f32 %v1116_v48, %v1164_v52  ;;  %v1183_v27 = vsub.f32 %v3471_v49, %v1167_v53  ;;  %v1129_v53 = vld [vmem:[#allocation3 + $0x68] sm:$0xff] }
 0x43e   : > { %v1135_v55 = vpop.xlane.xlu0 %1134 }
 0x43f   : > { %v1165_v56 = vmax.f32 %v3477_v54, %v1135_v55  ;;  %v1196_v24 = vmul.f32 1.442695, %v1180_v16  ;;  %v1202_v46 = vmul.f32 1.442695, %v1183_v27 }
 0x441   : > { %1703 = vst.msk [vmem:[#allocation3 + $0x8] sm:$0xff] %vm1436_vm1, %v1165_v56  ;;  %1235 = vperm.xlu1 %2595, %v1165_v56   ;;  %v1181_v26 = vsub.f32 %v3477_v54, %v1165_v56  ;;  %2605 = vpow2.f32 %v1196_v24 }
 0x442   : > { %v1145_v59 = vpop.xlane.xlu0 %1144  ;;  %v1147_v60 = vpop.xlane.xlu1 %1146  ;;  %2607 = vpow2.f32 %v1202_v46 }
 0x443   : > { %v3488_v61 = vmax.f32 %v3482_v57, %v1145_v59  ;;  %v3491_v62 = vmax.f32 %v3484_v58, %v1147_v60  ;;  %v1198_v49 = vmul.f32 1.442695, %v1181_v26 }
 0x445   : > { %1708 = vst.msk [vmem:[#allocation3 + $0x30] sm:$0xff] %vm1436_vm1, %v3488_v61  ;;  %1709 = vst.msk [vmem:[#allocation3 + $0x38] sm:$0xff] %vm1436_vm1, %v3491_v62  ;;  %v1187_v50 = vsub.f32 %v3484_v58, %v3491_v62  ;;  %2609 = vpow2.f32 %v1198_v49  ;;  %v1186_v60 = vsub.f32 %v3482_v57, %v3488_v61 }
 0x446   : > { %v1141_v1 = vpop.xlane.xlu0 %1140  ;;  %v1143_v2 = vpop.xlane.xlu1 %1142  ;;  %2611 = vpow2.f32 %v1200_v47 }
 0x447   : > { %v3502_v3 = vmax.f32 %v3493_v63, %v1141_v1  ;;  %v3505_v5 = vmax.f32 %v3495_v0, %v1143_v2  ;;  %v1210_v56 = vmul.f32 1.442695, %v1187_v50 }
 0x449   : > { %1706 = vst.msk [vmem:[#allocation3 + $0x20] sm:$0xff] %vm1436_vm1, %v3502_v3  ;;  %1707 = vst.msk [vmem:[#allocation3 + $0x28] sm:$0xff] %vm1436_vm1, %v3505_v5  ;;  %1255 = vperm.xlu0 %2596, %v3505_v5   ;;  %1250 = vperm.xlu1 %2595, %v3502_v3   ;;  %v1184_v54 = vsub.f32 %v3493_v63, %v3502_v3  ;;  %v1185_v58 = vsub.f32 %v3495_v0, %v3505_v5  ;;  %2613 = vpow2.f32 %v1210_v56 }
 0x44a   : > { %v1153_v9 = vpop.xlane.xlu0 %1152  ;;  %v1149_v10 = vpop.xlane.xlu1 %1148  ;;  %v1208_v0 = vmul.f32 1.442695, %v1186_v60 }
 0x44b   : > { %v3518_v11 = vmax.f32 %v3507_v7, %v1153_v9  ;;  %v3521_v13 = vmax.f32 %v3509_v8, %v1149_v10  ;;  %v1206_v1 = vmul.f32 1.442695, %v1185_v58 }
 0x44d   : > { %1712 = vst.msk [vmem:[#allocation3 + $0x50] sm:$0xff] %vm1436_vm1, %v3518_v11  ;;  %1710 = vst.msk [vmem:[#allocation3 + $0x40] sm:$0xff] %vm1436_vm1, %v3521_v13  ;;  %1265 = vperm.xlu0 %2596, %v3491_v62   ;;  %1280 = vperm.xlu1 %2595, %v3518_v11   ;;  %v1204_v62 = vmul.f32 1.442695, %v1184_v54  ;;  %v1190_v2 = vsub.f32 %v3507_v7, %v3518_v11  ;;  %v1188_v9 = vsub.f32 %v3509_v8, %v3521_v13 }
 0x44e   : > { %v1155_v17 = vpop.xlane.xlu1 %1154  ;;  %v3582_v3 = vpop.eup %2605 }
 0x44f   : > { %v1175_v19 = vmax.f32 %v3523_v14, %v1155_v17  ;;  %2615 = vpow2.f32 %v1204_v62  ;;  %v3589_v10 = vpop.eup %2607  ;;  %v1212_v16 = vmul.f32 1.442695, %v1188_v9 }
 0x450   : > { %v1157_v21 = vpop.xlane.xlu0 %1156  ;;  %2617 = vpow2.f32 %v1206_v1 }
 0x451   : > { %1713 = vst.msk [vmem:[#allocation3 + $0x58] sm:$0xff] %vm1436_vm1, %v1175_v19  ;;  %1270 = vperm.xlu1 %2595, %v3521_v13   ;;  %v3539_v23 = vmax.f32 %v3531_v18, %v1157_v21  ;;  %v1191_v63 = vsub.f32 %v3523_v14, %v1175_v19  ;;  %2619 = vpow2.f32 %v1208_v0 }
 0x452   : > { %v1151_v4 = vpop.xlane.xlu1 %1150  ;;  %v3591_v11 = vpop.eup %2609 }
 0x453   : > { %v1173_v28 = vmax.f32 %v3534_v20, %v1151_v4  ;;  %1714 = vst.msk [vmem:[#allocation3 + $0x60] sm:$0xff] %vm1436_vm1, %v3539_v23  ;;  %v1218_v5 = vmul.f32 1.442695, %v1191_v63  ;;  %v3595_v17 = vpop.eup %2611 }
 0x454   : > { %v1161_v22 = vpop.xlane.xlu0 %1160 }
 0x455   : > { %1711 = vst.msk [vmem:[#allocation3 + $0x48] sm:$0xff] %vm1436_vm1, %v1173_v28  ;;  %1285 = vperm.xlu1 %2595, %v1175_v19   ;;  %v3552_v12 = vmax.f32 %v3542_v6, %v1161_v22  ;;  %v1189_v57 = vsub.f32 %v3534_v20, %v1173_v28  ;;  %2621 = vpow2.f32 %v1218_v5  ;;  %v1192_v19 = vsub.f32 %v3531_v18, %v3539_v23 }
 0x456   : > { %v1163_v48 = vpop.xlane.xlu1 %1162  ;;  %v3599_v13 = vpop.eup %2613 }
 0x457   : > { %v1194_v51 = vsub.f32 %v3542_v6, %v3552_v12  ;;  %1716 = vst.msk [vmem:[#allocation3 + $0x70] sm:$0xff] %vm1436_vm1, %v3552_v12  ;;  %v3563_v52 = vmax.f32 %v3548_v29, %v1163_v48  ;;  %v1214_v14 = vmul.f32 1.442695, %v1189_v57  ;;  %v1220_v21 = vmul.f32 1.442695, %v1192_v19 }
 0x459   : > { %v1195_v45 = vsub.f32 %v3548_v29, %v3563_v52  ;;  %1717 = vst.msk [vmem:[#allocation3 + $0x78] sm:$0xff] %vm1436_vm1, %v3563_v52  ;;  %1275 = vperm.xlu1 %2595, %v1173_v28  }
 0x45a   : > { %v1159_v55 = vpop.xlane.xlu1 %1158 }
 0x45b   : > { %v1177_v59 = vmax.f32 %v1129_v53, %v1159_v55 }
 0x45c   : > { %v3603_v20 = vpop.eup %2615 }
 0x45d   : > { %1715 = vst.msk [vmem:[#allocation3 + $0x68] sm:$0xff] %vm1436_vm1, %v1177_v59  ;;  %1260 = vperm.xlu1 %2595, %v3488_v61   ;;  %1295 = vperm.xlu0 %2596, %v1177_v59   ;;  %v1216_v61 = vmul.f32 1.442695, %v1190_v2  ;;  %v1193_v7 = vsub.f32 %v1129_v53, %v1177_v59  ;;  %v3605_v24 = vpop.eup %2617 }
 0x45e   : > { %v3609_v27 = vpop.eup %2619 }
 0x45f   : > { %2623 = vpow2.f32 %v1216_v61  ;;  %v1222_v8 = vmul.f32 1.442695, %v1193_v7 }
 0x460   : > { %2625 = vpow2.f32 %v1214_v14 }
 0x461   : > { %1290 = vperm.xlu1 %2595, %v3539_v23   ;;  %1305 = vperm.xlu0 %2596, %v3563_v52   ;;  %2627 = vpow2.f32 %v1212_v16 }
 0x462   : > { %2629 = vpow2.f32 %v1222_v8  ;;  %v3611_v18 = vpop.eup %2621 }
 0x463   : > { %2631 = vpow2.f32 %v1220_v21 }
 0x465   : > { %1300 = vperm.xlu1 %2595, %v3552_v12   ;;  %1471 = vperm.xlu0 %2596, %v3582_v3  }
 0x469   : > { %1476 = vperm.xlu1 %2595, %v3591_v11   ;;  %1486 = vperm.xlu0 %2596, %v3589_v10  }
 0x46c   : > { %v3615_v23 = vpop.eup %2623 }
 0x46d   : > { %1481 = vperm.xlu1 %2595, %v3595_v17   ;;  %1506 = vperm.xlu0 %2596, %v3599_v13   ;;  %v3617_v4 = vpop.eup %2625 }
 0x46e   : > { %v3621_v26 = vpop.eup %2627 }
 0x46f   : > { %v3623_v28 = vpop.eup %2629 }
 0x470   : > { %v3627_v22 = vpop.eup %2631 }
 0x471   : > { %1491 = vperm.xlu1 %2595, %v3603_v20   ;;  %1496 = vperm.xlu0 %2596, %v3605_v24  }
 0x475   : > { %1501 = vperm.xlu1 %2595, %v3609_v27   ;;  %1526 = vperm.xlu0 %2596, %v3611_v18  }
 0x479   : > { %1521 = vperm.xlu1 %2595, %v3615_v23   ;;  %1516 = vperm.xlu0 %2596, %v3617_v4  }
 0x47d   : > { %1511 = vperm.xlu1 %2595, %v3621_v26   ;;  %1536 = vperm.xlu0 %2596, %v3623_v28  }
 0x481   : > { %1531 = vperm.xlu1 %2595, %v3627_v22  }
 0x4b4   : > { %v1241_v35 = vpop.permute.xlu1 %1240 }
 0x4b5   : > { %v1310_v46 = vsub.f32 %v3418_v30, %v1241_v35 }
 0x4b7   : > { %v1328_v48 = vmul.f32 1.442695, %v1310_v46 }
 0x4b8   : > { %v1231_v49 = vpop.permute.xlu0 %1230  ;;  %v1246_v50 = vpop.permute.xlu1 %1245 }
 0x4b9   : > { %2633 = vpow2.f32 %v1328_v48  ;;  %v1308_v53 = vsub.f32 %v3421_v31, %v1231_v49  ;;  %v1311_v47 = vsub.f32 %v3423_v32, %v1246_v50 }
 0x4bb   : > { %v1324_v54 = vmul.f32 1.442695, %v1308_v53  ;;  %v1330_v55 = vmul.f32 1.442695, %v1311_v47 }
 0x4bc   : > { %v1236_v56 = vpop.permute.xlu1 %1235 }
 0x4bd   : > { %2635 = vpow2.f32 %v1324_v54  ;;  %v1309_v58 = vsub.f32 %v3427_v33, %v1236_v56 }
 0x4be   : > { %2637 = vpow2.f32 %v1330_v55 }
 0x4bf   : > { %v1326_v59 = vmul.f32 1.442695, %v1309_v58 }
 0x4c1   : > { %2639 = vpow2.f32 %v1326_v59 }
 0x4c4   : > { %v1256_v60 = vpop.permute.xlu0 %1255  ;;  %v1251_v62 = vpop.permute.xlu1 %1250 }
 0x4c5   : > { %v1313_v30 = vsub.f32 %v3438_v36, %v1256_v60  ;;  %v1312_v1 = vsub.f32 %v3432_v25, %v1251_v62 }
 0x4c6   : > { %v2634_v63 = vpop.eup %2633 }
 0x4c7   : > { %v1334_v0 = vmul.f32 1.442695, %v1313_v30  ;;  %v1332_v31 = vmul.f32 1.442695, %v1312_v1  ;;  %1392 = vadd.xlane.f32.xlu0 %v2634_v63 }
 0x4c8   : > { %v1266_v32 = vpop.permute.xlu0 %1265  ;;  %v1281_v2 = vpop.permute.xlu1 %1280 }
 0x4c9   : > { %2641 = vpow2.f32 %v1334_v0  ;;  %v1315_v5 = vsub.f32 %v3434_v15, %v1266_v32  ;;  %v1318_v15 = vsub.f32 %v3440_v37, %v1281_v2 }
 0x4ca   : > { %v2636_v57 = vpop.eup %2635  ;;  %2643 = vpow2.f32 %v1332_v31 }
 0x4cb   : > { %v1338_v33 = vmul.f32 1.442695, %v1315_v5  ;;  %1388 = vadd.xlane.f32.xlu1 %v2636_v57  ;;  %v2638_v9 = vpop.eup %2637  ;;  %v1344_v49 = vmul.f32 1.442695, %v1318_v15 }
 0x4cc   : > { %v1271_v61 = vpop.permute.xlu1 %1270  ;;  %v1566_v16 = vpack.c.bf16 %v2638_v9, %v2634_v63 }
 0x4cd   : > { %2645 = vpow2.f32 %v1338_v33  ;;  %v1316_v36 = vsub.f32 %v3444_v38, %v1271_v61 }
 0x4ce   : > { %v2640_v14 = vpop.eup %2639 }
 0x4cf   : > { %1394 = vadd.xlane.f32.xlu1 %v2638_v9  ;;  %1390 = vadd.xlane.f32.xlu0 %v2640_v14  ;;  %v1565_v25 = vpack.c.bf16 %v2640_v14, %v2636_v57  ;;  %v1340_v21 = vmul.f32 1.442695, %v1316_v36 }
 0x4d0   : > { %v1286_v7 = vpop.permute.xlu1 %1285 }
 0x4d1   : > { %v1319_v19 = vsub.f32 %v3446_v39, %v1286_v7  ;;  %2374 = vmatprep.mubr.bf16.mxu0 %v1565_v25  ;;  %v1224_v25 = vmul.f32 1.442695, %v1194_v51 }
 0x4d2   : > { %2375 = vmatmul.mubr.bf16.vlgmr.msra.gmra.mxu0 %v1566_v16  ;;  %v1226_v16 = vmul.f32 1.442695, %v1195_v45 }
 0x4d3   : > { %v1346_v8 = vmul.f32 1.442695, %v1319_v19 }
 0x4d4   : > { %v1276_v35 = vpop.permute.xlu1 %1275 }
 0x4d5   : > { %2647 = vpow2.f32 %v1346_v8  ;;  %v1317_v46 = vsub.f32 %v3450_v40, %v1276_v35 }
 0x4d6   : > { %v2642_v48 = vpop.eup %2641  ;;  %2649 = vpow2.f32 %v1340_v21 }
 0x4d7   : > { %v2644_v50 = vpop.eup %2643  ;;  %v1342_v53 = vmul.f32 1.442695, %v1317_v46 }
 0x4d8   : > { %v1296_v38 = vpop.permute.xlu0 %1295  ;;  %v1261_v47 = vpop.permute.xlu1 %1260  ;;  %v1567_v54 = vpack.c.bf16 %v2642_v48, %v2644_v50 }
 0x4d9   : > { %2651 = vpow2.f32 %v1342_v53  ;;  %v1321_v39 = vsub.f32 %v3463_v44, %v1296_v38  ;;  %v1314_v37 = vsub.f32 %v3429_v34, %v1261_v47 }
 0x4da   : > { %v2646_v55 = vpop.eup %2645  ;;  %2653 = vpow2.f32 %v1344_v49  ;;  %2378 = vmatprep.mubr.bf16.mxu0 %v1567_v54  ;;  %v1356_v54 = vld [vmem:[#allocation4] sm:$0xff] }
 0x4db   : > { %v1336_v56 = vmul.f32 1.442695, %v1314_v37  ;;  %1402 = vadd.xlane.f32.xlu1 %v2646_v55  ;;  %v1350_v58 = vmul.f32 1.442695, %v1321_v39  ;;  %v1372_v37 = vmul.f32 %v3582_v3, %v1356_v54 }
 0x4dc   : > { %v1306_v40 = vpop.permute.xlu0 %1305  ;;  %v1291_v59 = vpop.permute.xlu1 %1290 }
 0x4dd   : > { %v1323_v60 = vsub.f32 %v3460_v43, %v1306_v40  ;;  %v1320_v62 = vsub.f32 %v3455_v42, %v1291_v59  ;;  %2655 = vpow2.f32 %v1336_v56  ;;  %v1357_v56 = vld [vmem:[#allocation4 + $0x8] sm:$0xff] }
 0x4de   : > { %2657 = vpow2.f32 %v1350_v58  ;;  %v1359_v58 = vld [vmem:[#allocation4 + $0x18] sm:$0xff]  ;;  %v1373_v59 = vmul.f32 %v3591_v11, %v1357_v56  ;;  %v1364_v56 = vld [vmem:[#allocation4 + $0x40] sm:$0xff] }
 0x4df   : > { %v1354_v30 = vmul.f32 1.442695, %v1323_v60  ;;  %v1348_v1 = vmul.f32 1.442695, %v1320_v62  ;;  %1398 = vadd.xlane.f32.xlu1 %v2642_v48  ;;  %v1375_v60 = vmul.f32 %v3589_v10, %v1359_v58  ;;  %v1367_v10 = vld [vmem:[#allocation4 + $0x58] sm:$0xff] }
 0x4e0   : > { %v1301_v44 = vpop.permute.xlu1 %1300  ;;  %v3655_v12 = vpop.permute.xlu0 %1471 }
 0x4e1   : > { %2659 = vpow2.f32 %v1354_v30  ;;  %v1322_v34 = vsub.f32 %v3452_v41, %v1301_v44  ;;  %v1363_v44 = vld [vmem:[#allocation4 + $0x38] sm:$0xff] }
 0x4e2   : > { %v2648_v63 = vpop.eup %2647  ;;  %2661 = vpow2.f32 %v1348_v1  ;;  %v1379_v3 = vmul.f32 %v3599_v13, %v1363_v44 }
 0x4e3   : > { %v1352_v0 = vmul.f32 1.442695, %v1322_v34  ;;  %1410 = vadd.xlane.f32.xlu1 %v2648_v63  ;;  %v2650_v31 = vpop.eup %2649 }
 0x4e4   : > { %v3657_v51 = vpop.permute.xlu1 %1476  ;;  %v3659_v19 = vpop.permute.xlu0 %1486 }
 0x4e5   : > { %2663 = vpow2.f32 %v1352_v0 }
 0x4e6   : > { %v2652_v32 = vpop.eup %2651  ;;  %2665 = vpow2.f32 %v1224_v25 }
 0x4e7   : > { %v2654_v2 = vpop.eup %2653  ;;  %1406 = vadd.xlane.f32.xlu1 %v2652_v32  ;;  %v1569_v43 = vpack.c.bf16 %v2652_v32, %v2650_v31  ;;  %2667 = vpow2.f32 %v1226_v16 }
 0x4e8   : > { %v1570_v42 = vpack.c.bf16 %v2648_v63, %v2654_v2  ;;  %v3661_v15 = vpop.permute.xlu1 %1481  ;;  %v3663_v8 = vpop.permute.xlu0 %1506  ;;  %v1361_v63 = vld [vmem:[#allocation4 + $0x28] sm:$0xff] }
 0x4e9   : > { %2382 = vmatprep.mubr.bf16.mxu1 %v1569_v43  ;;  %v1377_v11 = vmul.f32 %v3605_v24, %v1361_v63  ;;  %v1456_v63 = vld [vmem:[#allocation5 + $0x18] sm:$0xff] }
 0x4ea   : > { %2383 = vmatmul.mubr.bf16.vlgmr.msra.gmra.mxu1 %v1570_v42  ;;  %v2656_v5 = vpop.eup %2655  ;;  %v1365_v42 = vld [vmem:[#allocation4 + $0x48] sm:$0xff] }
 0x4eb   : > { %1400 = vadd.xlane.f32.xlu0 %v2656_v5  ;;  %v1568_v57 = vpack.c.bf16 %v2646_v55, %v2656_v5  ;;  %v2658_v33 = vpop.eup %2657  ;;  %v1381_v13 = vmul.f32 %v3617_v4, %v1365_v42 }
 0x4ec   : > { %v3665_v21 = vpop.permute.xlu1 %1491  ;;  %v3667_v35 = vpop.permute.xlu0 %1496 }
 0x4ed   : > { %2379 = vmatmul.mubr.bf16.gmra.mxu0 %v1568_v57 }
 0x4ee   : > { %v2660_v61 = vpop.eup %2659 }
 0x4ef   : > { %v2662_v41 = vpop.eup %2661  ;;  %1418 = vadd.xlane.f32.xlu1 %v2660_v61  ;;  %1396 = vadd.xlane.f32.xlu0 %v2644_v50  ;;  %v1358_v50 = vld [vmem:[#allocation4 + $0x10] sm:$0xff] }
 0x4f0   : > { %v1571_v9 = vpack.c.bf16 %v2658_v33, %v2662_v41  ;;  %v3669_v29 = vpop.permute.xlu1 %1501  ;;  %v3671_v52 = vpop.permute.xlu0 %1526  ;;  %v1374_v53 = vmul.f32 %v3595_v17, %v1358_v50  ;;  %v1369_v50 = vld [vmem:[#allocation4 + $0x68] sm:$0xff] }
 0x4f2   : > { %v2664_v14 = vpop.eup %2663  ;;  %2386 = vmatprep.mubr.bf16.mxu1 %v1571_v9 }
 0x4f3   : > { %1414 = vadd.xlane.f32.xlu1 %v2658_v33  ;;  %v1572_v36 = vpack.c.bf16 %v2660_v61, %v2664_v14  ;;  %1408 = vadd.xlane.f32.xlu0 %v2654_v2  ;;  %v3649_v7 = vpop.eup %2665  ;;  %v1383_v2 = vmul.f32 %v3611_v18, %v1367_v10  ;;  %v1362_v61 = vld [vmem:[#allocation4 + $0x30] sm:$0xff] }
 0x4f4   : > { %v2668_v6 = vpop.eup %2667  ;;  %v3673_v45 = vpop.permute.xlu1 %1521  ;;  %v1378_v24 = vmul.f32 %v3609_v27, %v1362_v61  ;;  %v1459_v61 = vld [vmem:[#allocation5 + $0x8] sm:$0xff] }
 0x4f5   : > { %2387 = vmatmul.mubr.bf16.gmra.mxu1 %v1572_v36  ;;  %v3675_v46 = vpop.permute.xlu0 %1516 }
 0x4f7   : > { %1404 = vadd.xlane.f32.xlu0 %v2650_v31 }
 0x4f8   : > { %v3677_v48 = vpop.permute.xlu1 %1511 }
 0x4f9   : > { %v3679_v49 = vpop.permute.xlu0 %1536 }
 0x4fb   : > { %1416 = vadd.xlane.f32.xlu0 %v2664_v14  ;;  %v1360_v14 = vld [vmem:[#allocation4 + $0x20] sm:$0xff] }
 0x4fc   : > { %v3682_v38 = vpop.permute.xlu1 %1531  ;;  %v1376_v18 = vmul.f32 %v3603_v20, %v1360_v14  ;;  %v1380_v20 = vmul.f32 %v3621_v26, %v1364_v56  ;;  %v1453_v26 = vld [vmem:[#allocation5 + $0x30] sm:$0xff]  ;;  %v1462_v14 = vld [vmem:[#allocation5 + $0x20] sm:$0xff] }
 0x4ff   : > { %1412 = vadd.xlane.f32.xlu0 %v2662_v41  ;;  %v1371_v41 = vld [vmem:[#allocation4 + $0x78] sm:$0xff] }
 0x500   : > { %v1387_v36 = vmul.f32 %v2668_v6, %v1371_v41 }
 0x504   : > { %1541 = vperm.xlu1 %2595, %v3649_v7  }
 0x515   : > { %1546 = vperm.xlu0 %2596, %v2668_v6  }
 0x550   : > { %v1393_v47 = vpop.xlane.xlu0 %1392 }
 0x551   : > { %v1422_v39 = vadd.f32 %v1393_v47, %v1374_v53  ;;  %v1366_v47 = vld [vmem:[#allocation4 + $0x50] sm:$0xff] }
 0x552   : > { %v1382_v27 = vmul.f32 %v3615_v23, %v1366_v47  ;;  %v1368_v23 = vld [vmem:[#allocation4 + $0x60] sm:$0xff] }
 0x553   : > { %1439 = vst.msk [vmem:[#allocation4 + $0x10] sm:$0xff] %vm1436_vm1, %v1422_v39  ;;  %v1385_v39 = vmul.f32 %v3623_v28, %v1369_v50 }
 0x554   : > { %v1389_v55 = vpop.xlane.xlu1 %1388 }
 0x555   : > { %v1420_v40 = vadd.f32 %v1389_v55, %v1372_v37 }
 0x557   : > { %1437 = vst.msk [vmem:[#allocation4] sm:$0xff] %vm1436_vm1, %v1420_v40 }
 0x558   : > { %v1391_v17 = vpop.xlane.xlu0 %1390  ;;  %v1395_v62 = vpop.xlane.xlu1 %1394 }
 0x559   : > { %v1421_v30 = vadd.f32 %v1391_v17, %v1373_v59  ;;  %v1423_v1 = vadd.f32 %v1395_v62, %v1375_v60  ;;  %v1370_v59 = vld [vmem:[#allocation4 + $0x70] sm:$0xff] }
 0x55a   : > { %v1386_v28 = vmul.f32 %v3649_v7, %v1370_v59  ;;  %v1468_v59 = vld [vmem:[#allocation5 + $0x28] sm:$0xff] }
 0x55b   : > { %1438 = vst.msk [vmem:[#allocation4 + $0x8] sm:$0xff] %vm1436_vm1, %v1421_v30  ;;  %1440 = vst.msk [vmem:[#allocation4 + $0x18] sm:$0xff] %vm1436_vm1, %v1423_v1  ;;  %v1384_v30 = vmul.f32 %v3627_v22, %v1368_v23 }
 0x564   : > { %v1403_v34 = vpop.xlane.xlu1 %1402 }
 0x565   : > { %v1427_v0 = vadd.f32 %v1403_v34, %v1379_v3  ;;  %v1455_v3 = vld [vmem:[#allocation5 + $0x58] sm:$0xff] }
 0x566   : > { %v1551_v34 = vmul.f32 %v3661_v15, %v1455_v3  ;;  %v1463_v15 = vld [vmem:[#allocation5 + $0x10] sm:$0xff] }
 0x567   : > { %1444 = vst.msk [vmem:[#allocation4 + $0x38] sm:$0xff] %vm1436_vm1, %v1427_v0 }
 0x568   : > { %v1399_v31 = vpop.xlane.xlu1 %1398 }
 0x569   : > { %v1425_v32 = vadd.f32 %v1399_v31, %v1377_v11  ;;  %v1549_v11 = vmul.f32 %v3655_v12, %v1453_v26  ;;  %v1454_v31 = vld [vmem:[#allocation5] sm:$0xff]  ;;  %v1559_v12 = vmul.f32 %v3673_v45, %v1463_v15 }
 0x56b   : > { %1442 = vst.msk [vmem:[#allocation4 + $0x28] sm:$0xff] %vm1436_vm1, %v1425_v32  ;;  %v1552_v32 = vmul.f32 %v3659_v19, %v1456_v63 }
 0x56c   : > { %v1411_v43 = vpop.xlane.xlu1 %1410 }
 0x56d   : > { %v1431_v5 = vadd.f32 %v1411_v43, %v1383_v2  ;;  %v1550_v43 = vmul.f32 %v3657_v51, %v1454_v31 }
 0x56f   : > { %1448 = vst.msk [vmem:[#allocation4 + $0x58] sm:$0xff] %vm1436_vm1, %v1431_v5 }
 0x570   : > { %v1407_v57 = vpop.xlane.xlu1 %1406 }
 0x571   : > { %v1429_v33 = vadd.f32 %v1407_v57, %v1381_v13  ;;  %v1461_v57 = vld [vmem:[#allocation5 + $0x40] sm:$0xff] }
 0x572   : > { %v1557_v19 = vmul.f32 %v3677_v48, %v1461_v57 }
 0x573   : > { %1446 = vst.msk [vmem:[#allocation4 + $0x48] sm:$0xff] %vm1436_vm1, %v1429_v33  ;;  %v1464_v33 = vld [vmem:[#allocation5 + $0x38] sm:$0xff] }
 0x574   : > { %v1401_v9 = vpop.xlane.xlu0 %1400  ;;  %v1560_v51 = vmul.f32 %v3671_v52, %v1464_v33  ;;  %v1467_v52 = vld [vmem:[#allocation5 + $0x78] sm:$0xff] }
 0x575   : > { %v1426_v25 = vadd.f32 %v1401_v9, %v1378_v24  ;;  %v1457_v9 = vld [vmem:[#allocation5 + $0x50] sm:$0xff] }
 0x576   : > { %v1553_v45 = vmul.f32 %v3665_v21, %v1457_v9  ;;  %v1465_v21 = vld [vmem:[#allocation5 + $0x60] sm:$0xff] }
 0x577   : > { %1443 = vst.msk [vmem:[#allocation4 + $0x30] sm:$0xff] %vm1436_vm1, %v1426_v25 }
 0x578   : > { %v1419_v16 = vpop.xlane.xlu1 %1418  ;;  %v1397_v53 = vpop.xlane.xlu0 %1396 }
 0x579   : > { %v1435_v4 = vadd.f32 %v1419_v16, %v1387_v36  ;;  %v1424_v54 = vadd.f32 %v1397_v53, %v1376_v18  ;;  %v1555_v36 = vmul.f32 %v3669_v29, %v1459_v61  ;;  %v1460_v16 = vld [vmem:[#allocation5 + $0x48] sm:$0xff] }
 0x57b   : > { %1452 = vst.msk [vmem:[#allocation4 + $0x78] sm:$0xff] %vm1436_vm1, %v1435_v4  ;;  %1441 = vst.msk [vmem:[#allocation4 + $0x20] sm:$0xff] %vm1436_vm1, %v1424_v54  ;;  %v1558_v4 = vmul.f32 %v3675_v46, %v1462_v14  ;;  %v1458_v54 = vld [vmem:[#allocation5 + $0x68] sm:$0xff] }
 0x57c   : > { %v1415_v37 = vpop.xlane.xlu1 %1414  ;;  %v1409_v6 = vpop.xlane.xlu0 %1408 }
 0x57d   : > { %v1433_v55 = vadd.f32 %v1415_v37, %v1385_v39  ;;  %v1430_v58 = vadd.f32 %v1409_v6, %v1382_v27  ;;  %v1556_v37 = vmul.f32 %v3663_v8, %v1460_v16 }
 0x57f   : > { %1450 = vst.msk [vmem:[#allocation4 + $0x68] sm:$0xff] %vm1436_vm1, %v1433_v55  ;;  %1447 = vst.msk [vmem:[#allocation4 + $0x50] sm:$0xff] %vm1436_vm1, %v1430_v58  ;;  %v1554_v58 = vmul.f32 %v3667_v35, %v1458_v54 }
 0x580   : > { %v1405_v40 = vpop.xlane.xlu0 %1404  ;;  %v1542_v6 = vpop.permute.xlu1 %1541 }
 0x581   : > { %v1428_v60 = vadd.f32 %v1405_v40, %v1380_v20  ;;  %v1563_v20 = vmul.f32 %v1542_v6, %v1467_v52 }
 0x583   : > { %1445 = vst.msk [vmem:[#allocation4 + $0x40] sm:$0xff] %vm1436_vm1, %v1428_v60 }
 0x584   : > { %v1417_v17 = vpop.xlane.xlu0 %1416 }
 0x585   : > { %v1434_v62 = vadd.f32 %v1417_v17, %v1386_v28  ;;  %v1561_v17 = vmul.f32 %v3682_v38, %v1465_v21 }
 0x587   : > { %1451 = vst.msk [vmem:[#allocation4 + $0x70] sm:$0xff] %vm1436_vm1, %v1434_v62  ;;  %v1466_v62 = vld [vmem:[#allocation5 + $0x70] sm:$0xff] }
 0x588   : > { %v1413_v1 = vpop.xlane.xlu0 %1412  ;;  %v1562_v3 = vmul.f32 %v3679_v49, %v1466_v62 }
 0x589   : > { %v1432_v44 = vadd.f32 %v1413_v1, %v1384_v30 }
 0x58b   : > { %1449 = vst.msk [vmem:[#allocation4 + $0x60] sm:$0xff] %vm1436_vm1, %v1432_v44 }
 0x590   : > { %v1547_v60 = vpop.permute.xlu0 %1546 }
 0x591   : > { %v1564_v1 = vmul.f32 %v1547_v60, %v1468_v59 }
 0x592   : > { %v2376_v0 = vpop.f32.mrf.mxu0 }
 0x593   : > { %v1672_v7 = vadd.f32 %v2376_v0, %v1551_v34 }
 0x594   : > { %v1607_v10 = vpop.f32.mrf.mxu0 }
 0x595   : > { %1688 = vst [vmem:[#allocation5 + $0x58] sm:$0xff] %v1672_v7  ;;  %v1670_v2 = vadd.f32 %v1607_v10, %v1549_v11 }
 0x596   : > { %v2377_v22 = vpop.f32.mrf.mxu0 }
 0x597   : > { %1686 = vst [vmem:[#allocation5 + $0x30] sm:$0xff] %v1670_v2  ;;  %v1673_v42 = vadd.f32 %v2377_v22, %v1552_v32 }
 0x598   : > { %v1610_v5 = vpop.f32.mrf.mxu0 }
 0x599   : > { %1689 = vst [vmem:[#allocation5 + $0x18] sm:$0xff] %v1673_v42  ;;  %v1671_v13 = vadd.f32 %v1610_v5, %v1550_v43 }
 0x59b   : > { %1687 = vst [vmem:[#allocation5] sm:$0xff] %v1671_v13 }
 0x5aa   : > { %v2384_v24 = vpop.f32.mrf.mxu1 }
 0x5ab   : > { %v1680_v41 = vadd.f32 %v2384_v24, %v1559_v12 }
 0x5ac   : > { %v1639_v25 = vpop.f32.mrf.mxu1 }
 0x5ad   : > { %1696 = vst [vmem:[#allocation5 + $0x10] sm:$0xff] %v1680_v41  ;;  %v1678_v18 = vadd.f32 %v1639_v25, %v1557_v19  ;;  %v2380_v50 = vpop.f32.mrf.mxu0 }
 0x5ae   : > { %v2385_v53 = vpop.f32.mrf.mxu1  ;;  %v1676_v47 = vadd.f32 %v2380_v50, %v1555_v36 }
 0x5af   : > { %1694 = vst [vmem:[#allocation5 + $0x40] sm:$0xff] %v1678_v18  ;;  %v1681_v48 = vadd.f32 %v2385_v53, %v1560_v51  ;;  %v1623_v39 = vpop.f32.mrf.mxu0 }
 0x5b0   : > { %v1642_v27 = vpop.f32.mrf.mxu1  ;;  %1692 = vst [vmem:[#allocation5 + $0x8] sm:$0xff] %v1676_v47  ;;  %v1674_v29 = vadd.f32 %v1623_v39, %v1553_v45 }
 0x5b1   : > { %1697 = vst [vmem:[#allocation5 + $0x38] sm:$0xff] %v1681_v48  ;;  %v1679_v55 = vadd.f32 %v1642_v27, %v1558_v4  ;;  %v2381_v56 = vpop.f32.mrf.mxu0 }
 0x5b2   : > { %1690 = vst [vmem:[#allocation5 + $0x50] sm:$0xff] %v1674_v29  ;;  %v1677_v46 = vadd.f32 %v2381_v56, %v1556_v37 }
 0x5b3   : > { %1695 = vst [vmem:[#allocation5 + $0x20] sm:$0xff] %v1679_v55  ;;  %v1626_v40 = vpop.f32.mrf.mxu0 }
 0x5b4   : > { %1693 = vst [vmem:[#allocation5 + $0x48] sm:$0xff] %v1677_v46  ;;  %v1675_v28 = vadd.f32 %v1626_v40, %v1554_v58 }
 0x5b5   : > { %v2388_v8 = vpop.f32.mrf.mxu1 }
 0x5b6   : > { %v1684_v23 = vadd.f32 %v2388_v8, %v1563_v20  ;;  %1691 = vst [vmem:[#allocation5 + $0x68] sm:$0xff] %v1675_v28 }
 0x5b7   : > { %v1655_v30 = vpop.f32.mrf.mxu1 }
 0x5b8   : > { %1700 = vst [vmem:[#allocation5 + $0x78] sm:$0xff] %v1684_v23  ;;  %v1682_v35 = vadd.f32 %v1655_v30, %v1561_v17 }
 0x5b9   : > { %v2389_v44 = vpop.f32.mrf.mxu1 }
 0x5ba   : > { %1698 = vst [vmem:[#allocation5 + $0x60] sm:$0xff] %v1682_v35  ;;  %v1685_v26 = vadd.f32 %v2389_v44, %v1564_v1  ;;  %1721 = sbr.rel (%p2136_p5) target bundleno = 1646 (0x66e), region = 72 }
 0x5bb   : > { %v1658_v34 = vpop.f32.mrf.mxu1 }
 0x5bc   : > { %1701 = vst [vmem:[#allocation5 + $0x28] sm:$0xff] %v1685_v26  ;;  %v1683_v63 = vadd.f32 %v1658_v34, %v1562_v3 }
 0x5be   : > { %1699 = vst [vmem:[#allocation5 + $0x70] sm:$0xff] %v1683_v63 }
 0x5bf   : > { %v1724_v38 = vld [vmem:[#allocation4 + $0x10] sm:$0xff]  ;;  %v1722_v0 = vld [vmem:[#allocation4] sm:$0xff]  ;;  %v1725_v11 = vld [vmem:[#allocation4 + $0x18] sm:$0xff]  ;;  %v2973_v7 = vmov 0  }
 0x5c0   : > { %2670 = vset.pattern.permute.xlu1 %v2973_v7  ;;  %2669 = vset.pattern.permute.xlu0 %v2973_v7  ;;  %2671 = vrcp.f32 %v1724_v38  ;;  %v1723_v31 = vld [vmem:[#allocation4 + $0x8] sm:$0xff]  ;;  %v1726_v10 = vld [vmem:[#allocation4 + $0x20] sm:$0xff]  ;;  %v1729_v2 = vld [vmem:[#allocation4 + $0x38] sm:$0xff] }
 0x5c1   : > { %2673 = vrcp.f32 %v1722_v0  ;;  %v1727_v49 = vld [vmem:[#allocation4 + $0x28] sm:$0xff]  ;;  %v1866_v32 = vld [vmem:[#allocation6] sm:$0x1]  ;;  %v1728_v22 = vld [vmem:[#allocation4 + $0x30] sm:$0xff] }
 0x5c2   : > { %2675 = vrcp.f32 %v1725_v11  ;;  %2438 = vpush %v1866_v32  ;;  %v1731_v43 = vld [vmem:[#allocation4 + $0x48] sm:$0xff]  ;;  %v1730_v42 = vld [vmem:[#allocation4 + $0x40] sm:$0xff]  ;;  %v1733_v57 = vld [vmem:[#allocation4 + $0x58] sm:$0xff] }
 0x5c3   : > { %2677 = vrcp.f32 %v1723_v31  ;;  %v1732_v33 = vld [vmem:[#allocation4 + $0x50] sm:$0xff]  ;;  %v1735_v24 = vld [vmem:[#allocation4 + $0x68] sm:$0xff]  ;;  %v1734_v41 = vld [vmem:[#allocation4 + $0x60] sm:$0xff] }
 0x5c4   : > { %2679 = vrcp.f32 %v1727_v49  ;;  %v1737_v14 = vld [vmem:[#allocation4 + $0x78] sm:$0xff]  ;;  %v1736_v51 = vld [vmem:[#allocation4 + $0x70] sm:$0xff]  ;;  %v1885_v58 = vld [vmem:[%s3238_s19] sm:$0xff] }
 0x5c5   : > { %2681 = vrcp.f32 %v1726_v10  ;;  %v1756_v48 = vld [vmem:[#allocation5 + $0x58] sm:$0xff]  ;;  %v1754_v54 = vld [vmem:[#allocation5 + $0x30] sm:$0xff]  ;;  %v1755_v21 = vld [vmem:[#allocation5] sm:$0xff] }
 0x5c6   : > { %2683 = vrcp.f32 %v1729_v2  ;;  %v1887_v29 = vld [vmem:[%s3238_s19 + $0x10] sm:$0xff]  ;;  %v1888_v8 = vld [vmem:[%s3238_s19 + $0x18] sm:$0xff]  ;;  %v1759_v23 = vld [vmem:[#allocation5 + $0x68] sm:$0xff] }
 0x5c7   : > { %2685 = vrcp.f32 %v1728_v22  ;;  %v1757_v55 = vld [vmem:[#allocation5 + $0x18] sm:$0xff]  ;;  %v1886_v30 = vld [vmem:[%s3238_s19 + $0x8] sm:$0xff]  ;;  %v1889_v31 = vld [vmem:[%s3238_s19 + $0x20] sm:$0xff] }
 0x5c8   : > { %2687 = vrcp.f32 %v1731_v43  ;;  %v1758_v1 = vld [vmem:[#allocation5 + $0x50] sm:$0xff]  ;;  %v1761_v11 = vld [vmem:[#allocation5 + $0x48] sm:$0xff] }
 0x5c9   : > { %2689 = vrcp.f32 %v1730_v42  ;;  %v1890_v38 = vld [vmem:[%s3238_s19 + $0x28] sm:$0xff] }
 0x5ca   : > { %2691 = vrcp.f32 %v1733_v57  ;;  %v1760_v49 = vld [vmem:[#allocation5 + $0x8] sm:$0xff] }
 0x5cb   : > { %2693 = vrcp.f32 %v1732_v33  ;;  %v1762_v33 = vld [vmem:[#allocation5 + $0x40] sm:$0xff] }
 0x5cc   : > { %2695 = vrcp.f32 %v1735_v24 }
 0x5cd   : > { %v2672_v5 = vpop.eup %2671  ;;  %2697 = vrcp.f32 %v1734_v41 }
 0x5ce   : > { %v2674_v13 = vpop.eup %2673  ;;  %1782 = vperm.xlu1 %2670, %v2672_v5   ;;  %2699 = vrcp.f32 %v1737_v14  ;;  %v1892_v5 = vld [vmem:[%s3238_s19 + $0x38] sm:$0xff] }
 0x5cf   : > { %v2676_v15 = vpop.eup %2675  ;;  %1772 = vperm.xlu0 %2669, %v2674_v13   ;;  %2701 = vrcp.f32 %v1736_v51 }
 0x5d0   : > { %v2678_v12 = vpop.eup %2677 }
 0x5d1   : > { %v2680_v61 = vpop.eup %2679 }
 0x5d2   : > { %1787 = vperm.xlu1 %2670, %v2676_v15   ;;  %v2682_v19 = vpop.eup %2681  ;;  %v1763_v15 = vld [vmem:[#allocation5 + $0x20] sm:$0xff] }
 0x5d3   : > { %1777 = vperm.xlu0 %2669, %v2678_v12   ;;  %v2684_v9 = vpop.eup %2683  ;;  %v1891_v12 = vld [vmem:[%s3238_s19 + $0x30] sm:$0xff] }
 0x5d4   : > { %v2686_v25 = vpop.eup %2685 }
 0x5d5   : > { %v2688_v36 = vpop.eup %2687 }
 0x5d6   : > { %1797 = vperm.xlu1 %2670, %v2680_v61   ;;  %v2690_v18 = vpop.eup %2689 }
 0x5d7   : > { %1792 = vperm.xlu0 %2669, %v2682_v19   ;;  %v2692_v16 = vpop.eup %2691 }
 0x5d8   : > { %v2694_v50 = vpop.eup %2693 }
 0x5d9   : > { %v2696_v53 = vpop.eup %2695 }
 0x5da   : > { %1807 = vperm.xlu1 %2670, %v2684_v9   ;;  %v2698_v45 = vpop.eup %2697 }
 0x5db   : > { %1802 = vperm.xlu0 %2669, %v2686_v25   ;;  %v2700_v4 = vpop.eup %2699  ;;  %v1894_v25 = vld [vmem:[%s3238_s19 + $0x48] sm:$0xff] }
 0x5dc   : > { %v2702_v47 = vpop.eup %2701 }
 0x5de   : > { %1817 = vperm.xlu1 %2670, %v2688_v36   ;;  %v1765_v36 = vld [vmem:[#allocation5 + $0x38] sm:$0xff] }
 0x5df   : > { %1812 = vperm.xlu0 %2669, %v2690_v18  }
 0x5e2   : > { %1827 = vperm.xlu1 %2670, %v2692_v16   ;;  %v1893_v16 = vld [vmem:[%s3238_s19 + $0x40] sm:$0xff] }
 0x5e3   : > { %1822 = vperm.xlu0 %2669, %v2694_v50   ;;  %v1764_v50 = vld [vmem:[#allocation5 + $0x10] sm:$0xff] }
 0x5e6   : > { %1837 = vperm.xlu1 %2670, %v2696_v53  }
 0x5e7   : > { %1832 = vperm.xlu0 %2669, %v2698_v45  }
 0x5ea   : > { %1847 = vperm.xlu1 %2670, %v2700_v4  }
 0x5eb   : > { %1842 = vperm.xlu0 %2669, %v2702_v47  }
 0x5f3   : > { %s2439_s25 = spop %2438 }
 0x5f4   : > { %v3729_v27 = vstv %s2439_s25 }
 0x649   : > { %v1783_v39 = vpop.permute.xlu1 %1782 }
 0x64a   : > { %v1852_v37 = vmul.f32 %v1783_v39, %v1756_v48  ;;  %v1773_v52 = vpop.permute.xlu0 %1772  ;;  %v1896_v39 = vld [vmem:[%s3238_s19 + $0x58] sm:$0xff] }
 0x64b   : > { %v1850_v6 = vmul.f32 %v1773_v52, %v1754_v54  ;;  %v1767_v52 = vld [vmem:[#allocation5 + $0x70] sm:$0xff] }
 0x64c   : > { %v1871_v56 = vmul.f32 %v3729_v27, %v1852_v37 }
 0x64d   : > { %v1869_v46 = vmul.f32 %v3729_v27, %v1850_v6  ;;  %v1788_v20 = vpop.permute.xlu1 %1787 }
 0x64e   : > { %v1903_v40 = vadd.f32 %v1887_v29, %v1871_v56  ;;  %v1853_v59 = vmul.f32 %v1788_v20, %v1757_v55  ;;  %v1778_v60 = vpop.permute.xlu0 %1777  ;;  %v1895_v29 = vld [vmem:[%s3238_s19 + $0x50] sm:$0xff]  ;;  %v1766_v55 = vld [vmem:[#allocation5 + $0x60] sm:$0xff] }
 0x64f   : > { %v1901_v28 = vadd.f32 %v1885_v58, %v1869_v46  ;;  %v1851_v17 = vmul.f32 %v1778_v60, %v1755_v21 }
 0x650   : > { %1919 = vst [vmem:[%s3260_s17 + $0x10] sm:$0xff] %v1903_v40  ;;  %v1872_v62 = vmul.f32 %v3729_v27, %v1853_v59  ;;  %v1898_v59 = vld [vmem:[%s3238_s19 + $0x68] sm:$0xff] }
 0x651   : > { %1917 = vst [vmem:[%s3260_s17] sm:$0xff] %v1901_v28  ;;  %v1870_v35 = vmul.f32 %v3729_v27, %v1851_v17  ;;  %v1798_v44 = vpop.permute.xlu1 %1797  ;;  %v1769_v28 = vld [vmem:[#allocation5 + $0x28] sm:$0xff] }
 0x652   : > { %v1904_v3 = vadd.f32 %v1888_v8, %v1872_v62  ;;  %v1855_v26 = vmul.f32 %v1798_v44, %v1759_v23  ;;  %v1793_v34 = vpop.permute.xlu0 %1792  ;;  %v1897_v17 = vld [vmem:[%s3238_s19 + $0x60] sm:$0xff]  ;;  %v1768_v23 = vld [vmem:[#allocation5 + $0x78] sm:$0xff] }
 0x653   : > { %v1902_v63 = vadd.f32 %v1886_v30, %v1870_v35  ;;  %v1854_v0 = vmul.f32 %v1793_v34, %v1758_v1 }
 0x654   : > { %1920 = vst [vmem:[%s3260_s17 + $0x18] sm:$0xff] %v1904_v3  ;;  %v1874_v7 = vmul.f32 %v3729_v27, %v1855_v26  ;;  %v1900_v26 = vld [vmem:[%s3238_s19 + $0x78] sm:$0xff] }
 0x655   : > { %1918 = vst [vmem:[%s3260_s17 + $0x8] sm:$0xff] %v1902_v63  ;;  %v1873_v10 = vmul.f32 %v3729_v27, %v1854_v0  ;;  %v1808_v32 = vpop.permute.xlu1 %1807 }
 0x656   : > { %v1906_v2 = vadd.f32 %v1890_v38, %v1874_v7  ;;  %v1857_v22 = vmul.f32 %v1808_v32, %v1761_v11  ;;  %v1803_v43 = vpop.permute.xlu0 %1802  ;;  %v1899_v38 = vld [vmem:[%s3238_s19 + $0x70] sm:$0xff] }
 0x657   : > { %v1905_v42 = vadd.f32 %v1889_v31, %v1873_v10  ;;  %v1856_v13 = vmul.f32 %v1803_v43, %v1760_v49 }
 0x658   : > { %1922 = vst [vmem:[%s3260_s17 + $0x28] sm:$0xff] %v1906_v2  ;;  %v1876_v57 = vmul.f32 %v3729_v27, %v1857_v22 }
 0x659   : > { %1921 = vst [vmem:[%s3260_s17 + $0x20] sm:$0xff] %v1905_v42  ;;  %v1875_v61 = vmul.f32 %v3729_v27, %v1856_v13  ;;  %v1818_v24 = vpop.permute.xlu1 %1817 }
 0x65a   : > { %v1908_v19 = vadd.f32 %v1892_v5, %v1876_v57  ;;  %v1859_v41 = vmul.f32 %v1818_v24, %v1763_v15  ;;  %v1813_v9 = vpop.permute.xlu0 %1812 }
 0x65b   : > { %v1907_v14 = vadd.f32 %v1891_v12, %v1875_v61  ;;  %v1858_v51 = vmul.f32 %v1813_v9, %v1762_v33 }
 0x65c   : > { %1924 = vst [vmem:[%s3260_s17 + $0x38] sm:$0xff] %v1908_v19  ;;  %v1878_v18 = vmul.f32 %v3729_v27, %v1859_v41 }
 0x65d   : > { %1923 = vst [vmem:[%s3260_s17 + $0x30] sm:$0xff] %v1907_v14  ;;  %v1877_v53 = vmul.f32 %v3729_v27, %v1858_v51  ;;  %v1828_v45 = vpop.permute.xlu1 %1827 }
 0x65e   : > { %v1910_v4 = vadd.f32 %v1894_v25, %v1878_v18  ;;  %v1861_v47 = vmul.f32 %v1828_v45, %v1765_v36  ;;  %v1823_v48 = vpop.permute.xlu0 %1822 }
 0x65f   : > { %v1909_v54 = vadd.f32 %v1893_v16, %v1877_v53  ;;  %v1860_v37 = vmul.f32 %v1823_v48, %v1764_v50 }
 0x660   : > { %1926 = vst [vmem:[%s3260_s17 + $0x48] sm:$0xff] %v1910_v4  ;;  %v1880_v6 = vmul.f32 %v3729_v27, %v1861_v47 }
 0x661   : > { %1925 = vst [vmem:[%s3260_s17 + $0x40] sm:$0xff] %v1909_v54  ;;  %v1879_v56 = vmul.f32 %v3729_v27, %v1860_v37  ;;  %v1838_v58 = vpop.permute.xlu1 %1837 }
 0x662   : > { %v1912_v21 = vadd.f32 %v1896_v39, %v1880_v6  ;;  %v1863_v46 = vmul.f32 %v1838_v58, %v1767_v52  ;;  %v1833_v20 = vpop.permute.xlu0 %1832 }
 0x663   : > { %v1911_v40 = vadd.f32 %v1895_v29, %v1879_v56  ;;  %v1862_v60 = vmul.f32 %v1833_v20, %v1766_v55 }
 0x664   : > { %1928 = vst [vmem:[%s3260_s17 + $0x58] sm:$0xff] %v1912_v21  ;;  %v1882_v8 = vmul.f32 %v3729_v27, %v1863_v46 }
 0x665   : > { %1927 = vst [vmem:[%s3260_s17 + $0x50] sm:$0xff] %v1911_v40  ;;  %v1881_v62 = vmul.f32 %v3729_v27, %v1862_v60  ;;  %v1848_v30 = vpop.permute.xlu1 %1847 }
 0x666   : > { %v1914_v1 = vadd.f32 %v1898_v59, %v1882_v8  ;;  %v1865_v35 = vmul.f32 %v1848_v30, %v1769_v28  ;;  %v1843_v44 = vpop.permute.xlu0 %1842 }
 0x667   : > { %v1913_v3 = vadd.f32 %v1897_v17, %v1881_v62  ;;  %v1864_v34 = vmul.f32 %v1843_v44, %v1768_v23 }
 0x668   : > { %1930 = vst [vmem:[%s3260_s17 + $0x68] sm:$0xff] %v1914_v1  ;;  %v1884_v63 = vmul.f32 %v3729_v27, %v1865_v35 }
 0x669   : > { %1929 = vst [vmem:[%s3260_s17 + $0x60] sm:$0xff] %v1913_v3  ;;  %v1883_v0 = vmul.f32 %v3729_v27, %v1864_v34 }
 0x66a   : > { %v1916_v11 = vadd.f32 %v1900_v26, %v1884_v63 }
 0x66b   : > { %v1915_v7 = vadd.f32 %v1899_v38, %v1883_v0 }
 0x66c   : > { %1932 = vst [vmem:[%s3260_s17 + $0x78] sm:$0xff] %v1916_v11 }
 0x66d   : > { %1931 = vst [vmem:[%s3260_s17 + $0x70] sm:$0xff] %v1915_v7 }
 0x66e PF: > { %s3931_s21 = sld [smem:[#allocation23_spill]]  ;;  %s1949_s29 = sshll.u32 %s3260_s17, 4  ;;  %s3782_s29 = int_to_ptr.vmem [resolvable:$true] %s1949_s29 }
 0x66f   : > { %s3932_s22 = sld [smem:[#allocation24_spill]]  ;;  %s1934_s9 = scalar_lea.sflag [#allocation9], %s3234_s23 }
 0x670   : > { %s3934_s6 = sld [smem:[#allocation37_spill]]  ;;  %s2811_s10 = scalar_lea.vmem %s3782_s29, 2048 }
 0x671   : > { %p2812_p0 = scmp.ne.s32.totalorder %s3782_s29, %s2811_s10  ;;  %s2974_s5 = smov [#allocation15]  }
 0x672   : > { %s2815_s17 = sshll.u32 %s2974_s5, 4  ;;  %s2816_s17 = int_to_ptr.vmem [resolvable:$false] %s2815_s17 }
 0x673   : > { %p2813_p10 = pnand %p2812_p0, %p3153_p2  ;;  %s2817_s15 = scalar_lea.vmem %s2816_s17, 4096 }
 0x674   : > { %s2138_s20 = sshll.u32 %s3931_s21, 4  ;;  %p2818_p6 = scmp.lt.s32.totalorder %s3782_s29, %s2816_s17 }
 0x675   : > { %s2139_s18 = sshll.u32 %s3932_s22, 5  ;;  %p2814_p12 = pneg %p2813_p10 }
 0x676   : > { %s1946_s4 = sadd.s32 %s2139_s18, %s2138_s20  ;;  %s3935_s24 = smov %s3934_s6 }
 0x677   : > { %s2140_s19 = sshll.u32 %s1946_s4, 7  ;;  %p2819_p4 = scmp.lt.s32.totalorder %s2817_s15, %s2811_s10 }
 0x678   : > { %s3787_s12 = scalar_lea.hbm %s3934_s6, %s2140_s19 }
 0x679   : > { %p2820_p1 = por %p2819_p4, %p2818_p6 }
 0x67b   : > { %p2821_p7 = pnand %p2820_p1, %p2814_p12 }
 0x67d   : > { %2824 = shalt.err (!%p2821_p7)
}
 0x67e   : > { %s2825_s25 = scalar_lea.hbm %s3787_s12, 2048  ;;  %s2829_s20 = scalar_lea.hbm %s3935_s24, 8192 }
 0x67f   : > { %p2826_p9 = scmp.ne.s32.totalorder %s3787_s12, %s2825_s25  ;;  %p2830_p11 = scmp.lt.s32.totalorder %s3787_s12, %s3935_s24 }
 0x680   : > { %p2831_p13 = scmp.lt.s32.totalorder %s2829_s20, %s2825_s25 }
 0x681   : > { %p2827_p8 = pnand %p2826_p9, %p3153_p2 }
 0x682   : > { %p2832_p5 = por %p2831_p13, %p2830_p11 }
 0x683   : > { %p2828_p3 = pneg %p2827_p8 }
 0x685   : > { %p2833_p0 = pnand %p2832_p5, %p2828_p3 }
 0x687   : > { %2836 = shalt.err (!%p2833_p0)
}
 0x688   : > { %s2975_s19 = smov 128   ;;  %s2976_s2 = smov 8  }
 0x689   : > { %2452 = dma.vmem_to_hbm [thread:$0]  (%p3153_p2), %s3782_s29, 2048, %s3787_s12, %s1934_s9, %s2975_s19, %s2975_s19, %s2976_s2  }
 0x68a PF: > { %s3936_s3 = sld [smem:[#allocation21_spill]]  ;;  %p2477_p10 = scmp.ge.s32.totalorder %s2959_s14, 2 }
 0x68b   : > { %s3937_s6 = sld [smem:[#allocation28_spill]] }
 0x690   : > { %s1964_s10 = sand.u32 1, %s3936_s3  }
 0x691   : > { %p3938_p12 = scmp.ne.s32.totalorder %s3937_s6, 0  ;;  %s1965_s5 = scalar_lea.sflag [#allocation9], %s1964_s10 }
 0x693   : > { %p2469_p6 = pnand %p2477_p10, %p3938_p12 }
 0x695   : > { %p2470_p4 = pneg %p2469_p6 }
 0x697   : > { %2906 = dma.done.wait (%p2470_p4), %s1965_s5, 2048  }
 0x698   : > { %2908 = vsyncadd (%p2470_p4), %s1965_s5, 4294965248  ;;  %s29_s14 = sadd.s32 1, %s2959_s14   ;;  %s3940_s23 = smov %s3209_s26 }
 0x699   : > { %p3817_p1 = scmp.ge.s32.totalorder %s29_s14, 10   ;;  %s3941_s9 = sld [smem:[#allocation25_spill]] }
 0x69a   : > { %s3942_s7 = sld [smem:[#allocation29_spill]]  ;;  %s3945_s26 = smov %s2915_s27 }
 0x69b   : > { %s3943_s12 = sld [smem:[#allocation31_spill]]  ;;  %s3946_s27 = smov %s2919_s28 }
 0x69c   : > { %s3944_s15 = sld [smem:[#allocation32_spill]]  ;;  %s3947_s28 = smov %s3940_s23 }
 0x69d   : > { %s3948_s29 = smov %s2927_s30  ;;  %s3949_s30 = smov %s2931_s8 }
 0x69e   : > { %s3950_s8 = smov %s3181_s16  ;;  %s3951_s6 = smov %s2947_s11 }
 0x69f   : > { %s3952_s10 = smov %s2955_s13  ;;  %28 = sbr.rel (!%p3817_p1) target bundleno = 19 (0x13), region = 122 }
 0x6a0   : > { %s3953_s11 = smov %s3942_s7 }
 0x6a2   : > { %s3954_s13 = smov %s3944_s15 }
 0x6a4   :  { %1970 = vsyncpa [#allocation8], 1 }
 0x6a5   :  { %1972 = vsyncpa [#allocation8 + $0x1], 1 }
 0x6a6   :  { %1973 = vsyncpa [#allocation11], 1 }
 0x6a7   :  { %1975 = vsyncpa [#allocation11 + $0x1], 1 }
 0x6a8   :  { %1976 = vsyncpa [#allocation14], 1 }
 0x6a9   :  { %1977 = vsyncpa [#allocation9], 1 }
 0x6aa   :  { %1979 = vsyncpa [#allocation9 + $0x1], 1 }

</bundles_post_ra>
